<compile_context>
chip_gen: v7x
topology: tpu7x:2x2x1
jax: 0.10.0
libtpu: 0.0.40
codegen_flags: <defaults>
</compile_context>

<pallas_src>
import functools

import jax
import jax.numpy as jnp
from jax import lax
from jax.experimental import pallas as pl
from jax.experimental.pallas import tpu as pltpu


def _pool2x2(v, H, W):
    """2x2 max-pool (stride 2) of an (H*W, C) map (pixels on sublanes, row-major h*W+w)."""
    Hp, Wp = H // 2, W // 2
    Cc = v.shape[-1]
    # pair adjacent w positions: row h*W + w  ->  [h*Wp + m, j] with w = 2m + j
    v = v.reshape(H * Wp, 2, Cc)
    v = jnp.max(v, axis=1)                       # (H*Wp, C)
    # pair adjacent h rows: cols [0:Wp) hold h even, cols [Wp:2Wp) hold h odd
    v = v.reshape(Hp, 2 * Wp, Cc)
    v = jnp.maximum(v[:, :Wp, :], v[:, Wp:, :])  # (Hp, Wp, C)
    return v.reshape(Hp * Wp, Cc)


def _stage1_kernel(x_ref, sb1_ref, w_ref, b_ref, y_ref, stats_ref, *, H, W, ci, inv_n):
    x = x_ref[...]                                        # (C, HW) f32
    s1 = sb1_ref[:, 0:1]                                  # (C, 1)
    b1 = sb1_ref[:, 1:2]                                  # (C, 1)
    xn = jnp.maximum(x * s1 + b1, 0.0)                    # BN1 (folded) + ReLU

    # Fused theta/phi/g 1x1 convs: single MXU push contracting the channel axis.
    proj = lax.dot_general(
        xn.astype(jnp.bfloat16), w_ref[...],
        (((0,), (0,)), ((), ())),
        preferred_element_type=jnp.float32) + b_ref[...]  # (HW, 2Ci+Cg)

    theta = proj[:, :ci]                                  # (HW, Ci) f32
    pg_p = _pool2x2(proj[:, ci:], H, W)                   # (Np, Ci+Cg) f32
    phi_p = pg_p[:, :ci]                                  # (Np, Ci)
    g_p = pg_p[:, ci:]                                    # (Np, Cg)

    # Reassociated dot-mode attention (purely linear, no softmax):
    #   y^T = (1/N) * g_p^T @ (phi_p @ theta^T) == ((1/N) * g_p^T @ phi_p) @ theta^T
    # -> tiny (Cg, Ci) intermediate instead of the (Np, HW) similarity map.
    a = lax.dot_general(
        g_p, phi_p, (((0,), (0,)), ((), ())),
        preferred_element_type=jnp.float32) * inv_n       # (Cg, Ci) f32
    y_t = lax.dot_general(
        a, theta, (((1,), (1,)), ((), ())),
        preferred_element_type=jnp.float32)               # (Cg, HW) -- lane-dense
    y_ref[...] = y_t

    # Per-batch partial BN2 batch statistics (reduced over pixels while y is in VMEM).
    stats_ref[...] = jnp.concatenate(
        [jnp.sum(y_t, axis=1, keepdims=True),
         jnp.sum(y_t * y_t, axis=1, keepdims=True)], axis=1)        # (Cg, 2)


def _stage2_kernel(y_ref, x_ref, stats_ref, g2b2_ref, wz_ref, bz_ref, z_ref, *,
                   inv_cnt, eps):
    # Fold BN2 in-kernel from the cross-batch partial sums (tiny; recomputed per
    # grid step -> no plain-JAX glue between the two pallas_calls).
    s_sum = jnp.sum(stats_ref[...], axis=0)                            # (Cg, 2)
    mean2 = s_sum[:, 0:1] * inv_cnt                                    # (Cg, 1)
    # TODO(synk): E[y^2]-E[y]^2 can cancel catastrophically when |mean| >> std;
    # a centered second pass over y would be more robust if accuracy matters.
    var2 = jnp.maximum(s_sum[:, 1:2] * inv_cnt - mean2 * mean2, 0.0)   # (Cg, 1)
    s2 = g2b2_ref[:, 0:1] * lax.rsqrt(var2 + eps)                      # (Cg, 1)
    b2 = g2b2_ref[:, 1:2] - mean2 * s2                                 # (Cg, 1)

    yn = jnp.maximum(y_ref[...] * s2 + b2, 0.0)                        # BN2 + ReLU
    wy = jnp.dot(wz_ref[...], yn.astype(jnp.bfloat16),
                 preferred_element_type=jnp.float32) + bz_ref[...]     # (C, HW)
    z_ref[...] = wy + x_ref[...]                                       # residual (x aliased to z)


def nl_block_forward(x_nchw, p):
    B, C, H, W = x_nchw.shape
    HW = H * W
    Np = (H // 2) * (W // 2)
    Ci = p["w_theta"].shape[0]
    Cg = p["w_g"].shape[0]
    K = 2 * Ci + Cg
    eps = 1e-5

    # NCHW-flat: pure reshape, no HBM transpose at entry or exit.
    xf = x_nchw.reshape(B, C, HW).astype(jnp.float32)

    # ---- fold BN1 (training-mode batch statistics, biased variance) ----
    # One-pass statistics: a single read of x instead of two.
    mean1 = jnp.mean(xf, axis=(0, 2))
    var1 = jnp.maximum(jnp.mean(xf * xf, axis=(0, 2)) - mean1 * mean1, 0.0)
    s1 = p["gamma1"] / jnp.sqrt(var1 + eps)
    b1 = p["beta1"] - mean1 * s1
    sb1 = jnp.stack([s1, b1], axis=1).astype(jnp.float32)            # (C, 2)

    # ---- fused projection weights (theta | phi | g); 1/N applied in-kernel ----
    w_all = jnp.concatenate(
        [p["w_theta"], p["w_phi"], p["w_g"]], axis=0).T              # (C, K)
    b_all = jnp.concatenate(
        [p["b_theta"], p["b_phi"], p["b_g"]]).reshape(1, K)          # (1, K)

    full = lambda shape: pl.BlockSpec(shape, lambda b: (0,) * len(shape))

    stage1 = pl.pallas_call(
        functools.partial(_stage1_kernel, H=H, W=W, ci=Ci, inv_n=1.0 / Np),
        out_shape=(jax.ShapeDtypeStruct((B, Cg, HW), jnp.float32),
                   jax.ShapeDtypeStruct((B, Cg, 2), jnp.float32)),
        grid=(B,),
        in_specs=[
            pl.BlockSpec((None, C, HW), lambda b: (b, 0, 0)),
            full((C, 2)),
            full((C, K)),
            full((1, K)),
        ],
        out_specs=(pl.BlockSpec((None, Cg, HW), lambda b: (b, 0, 0)),
                   pl.BlockSpec((None, Cg, 2), lambda b: (b, 0, 0))),
        compiler_params=pltpu.CompilerParams(dimension_semantics=("parallel",)),
    )
    y, stats = stage1(xf, sb1, w_all.astype(jnp.bfloat16),
                      b_all.astype(jnp.float32))

    # Param-only prep (off the stage1->stage2 critical path).
    g2b2 = jnp.stack([p["gamma2"], p["beta2"]], axis=1).astype(jnp.float32)  # (Cg, 2)

    stage2 = pl.pallas_call(
        functools.partial(_stage2_kernel, inv_cnt=1.0 / (B * HW), eps=eps),
        out_shape=jax.ShapeDtypeStruct((B, C, HW), jnp.float32),
        grid=(B,),
        in_specs=[
            pl.BlockSpec((None, Cg, HW), lambda b: (b, 0, 0)),   # y
            pl.BlockSpec((None, C, HW), lambda b: (b, 0, 0)),    # x (aliased to z)
            full((B, Cg, 2)),                                    # BN2 partial stats
            full((Cg, 2)),                                       # gamma2 | beta2
            full((C, Cg)),                                       # W_z
            full((C, 1)),                                        # b_z
        ],
        out_specs=pl.BlockSpec((None, C, HW), lambda b: (b, 0, 0)),
        input_output_aliases={1: 0},   # xf is dead after the residual add
        compiler_params=pltpu.CompilerParams(dimension_semantics=("parallel",)),
    )
    z = stage2(y, xf, stats, g2b2, p["w_z"].astype(jnp.bfloat16),
               p["b_z"].reshape(C, 1).astype(jnp.float32))
    return z.reshape(B, C, H, W)


# ---------------- deterministic parameter construction ----------------
def make_params(key, C, Ci, Cg):
    ks = jax.random.split(key, 12)
    kaiming = lambda k, cout, cin: (jax.random.normal(k, (cout, cin), jnp.float32)
                                    * jnp.sqrt(2.0 / cin))
    return dict(
        gamma1=1.0 + 0.1 * jax.random.normal(ks[0], (C,), jnp.float32),
        beta1=0.1 * jax.random.normal(ks[1], (C,), jnp.float32),
        w_theta=kaiming(ks[2], Ci, C),
        b_theta=0.05 * jax.random.normal(ks[3], (Ci,), jnp.float32),
        w_phi=kaiming(ks[4], Ci, C),
        b_phi=0.05 * jax.random.normal(ks[5], (Ci,), jnp.float32),
        w_g=kaiming(ks[6], Cg, C),
        b_g=0.05 * jax.random.normal(ks[7], (Cg,), jnp.float32),
        gamma2=1.0 + 0.1 * jax.random.normal(ks[8], (Cg,), jnp.float32),
        beta2=0.1 * jax.random.normal(ks[9], (Cg,), jnp.float32),
        w_z=kaiming(ks[10], C, Cg),
        b_z=0.05 * jax.random.normal(ks[11], (C,), jnp.float32),
    )


# ---------------- pure-JAX reference mirroring the PyTorch forward -------------
def reference_forward(x, p):
    B, C, H, W = x.shape
    eps = 1e-5

    def bn_relu(v, gamma, beta):
        mean = jnp.mean(v, axis=(0, 2, 3), keepdims=True)
        var = jnp.mean((v - mean) ** 2, axis=(0, 2, 3), keepdims=True)
        out = (v - mean) / jnp.sqrt(var + eps)
        out = out * gamma.reshape(1, -1, 1, 1) + beta.reshape(1, -1, 1, 1)
        return jnp.maximum(out, 0.0)

    def conv1x1(v, w, b):
        return jnp.einsum('oc,bchw->bohw', w, v) + b.reshape(1, -1, 1, 1)

    def maxpool2(v):
        b_, c_, h_, w_ = v.shape
        return jnp.max(v.reshape(b_, c_, h_ // 2, 2, w_ // 2, 2), axis=(3, 5))

    Ci = p["w_theta"].shape[0]
    Cg = p["w_g"].shape[0]
    xn = bn_relu(x, p["gamma1"], p["beta1"])
    g_x = maxpool2(conv1x1(xn, p["w_g"], p["b_g"])).reshape(B, Cg, -1).transpose(0, 2, 1)
    theta = conv1x1(xn, p["w_theta"], p["b_theta"]).reshape(B, Ci, -1).transpose(0, 2, 1)
    phi = maxpool2(conv1x1(xn, p["w_phi"], p["b_phi"])).reshape(B, Ci, -1)
    f = theta @ phi
    y = (f / f.shape[-1]) @ g_x
    y = y.transpose(0, 2, 1).reshape(B, Cg, H, W)
    w_y = conv1x1(bn_relu(y, p["gamma2"], p["beta2"]), p["w_z"], p["b_z"])
    return w_y + x


if __name__ == "__main__":
    B, C, H, W = 2, 32, 16, 16          # in_channels=32 -> inter=4, g=8
    Ci, Cg = C // 8, C // 4
    key = jax.random.PRNGKey(0)
    kx, kp = jax.random.split(key)
    x = jax.random.normal(kx, (B, C, H, W), jnp.float32)
    params = make_params(kp, C, Ci, Cg)

    fwd = jax.jit(nl_block_forward)
    z = fwd(x, params)
    jax.block_until_ready(z)

    z_ref = reference_forward(x, params)
    err = float(jnp.max(jnp.abs(z - z_ref)))
    assert z.shape == x.shape, (z.shape, x.shape)
    # Projection / W_z matmuls use bf16 MXU operands vs. a float32 reference
    # (errors amplified by the BN2 normalization); tolerance sized accordingly.
    assert err < 2e-1, f"max abs err vs reference: {err}"
    print("KERNEL_OK")
</pallas_src>

<mosaic_0001>
module attributes {stable_mosaic.version = 11 : i64} {
  func.func @_stage2_kernel(%arg0: i32, %arg1: memref<1x8x256xf32, #tpu.memory_space<vmem>>, %arg2: memref<1x32x256xf32, #tpu.memory_space<vmem>>, %arg3: memref<2x8x2xf32, #tpu.memory_space<vmem>>, %arg4: memref<8x2xf32, #tpu.memory_space<vmem>>, %arg5: memref<32x8xbf16, #tpu.memory_space<vmem>>, %arg6: memref<32x1xf32, #tpu.memory_space<vmem>>, %arg7: memref<1x32x256xf32, #tpu.memory_space<vmem>>) attributes {dimension_semantics = [#tpu.dimension_semantics<parallel>], iteration_bounds = array<i64: 2>, scalar_prefetch = 0 : i64, scratch_operands = 0 : i64, tpu.core_type = #tpu.core_type<tc>, window_params = [{transform_indices = @transform_0, window_bounds = array<i64: 1, 8, 256>}, {transform_indices = @transform_1, window_bounds = array<i64: 1, 32, 256>}, {pipeline_mode = #tpu.pipeline_mode<synchronous>, transform_indices = @transform_2, window_bounds = array<i64: 2, 8, 2>}, {pipeline_mode = #tpu.pipeline_mode<synchronous>, transform_indices = @transform_3, window_bounds = array<i64: 8, 2>}, {pipeline_mode = #tpu.pipeline_mode<synchronous>, transform_indices = @transform_4, window_bounds = array<i64: 32, 8>}, {pipeline_mode = #tpu.pipeline_mode<synchronous>, transform_indices = @transform_5, window_bounds = array<i64: 32, 1>}, {transform_indices = @transform_6, window_bounds = array<i64: 1, 32, 256>}]} {
    %c0 = arith.constant 0 : index
    %c0_0 = arith.constant 0 : index
    %c0_1 = arith.constant 0 : index
    %0 = vector.load %arg3[%c0, %c0_0, %c0_1] : memref<2x8x2xf32, #tpu.memory_space<vmem>>, vector<2x8x2xf32>
    %cst = arith.constant dense<0.000000e+00> : vector<8x2xf32>
    %1 = vector.multi_reduction <add>, %0, %cst [0] : vector<2x8x2xf32> to vector<8x2xf32>
    %2 = vector.extract_strided_slice %1 {offsets = [0, 0], sizes = [8, 1], strides = [1, 1]} : vector<8x2xf32> to vector<8x1xf32>
    %cst_2 = arith.constant 0.001953125 : f32
    %3 = vector.broadcast %cst_2 : f32 to vector<8x1xf32>
    %4 = arith.mulf %2, %3 : vector<8x1xf32>
    %5 = vector.extract_strided_slice %1 {offsets = [0, 1], sizes = [8, 1], strides = [1, 1]} : vector<8x2xf32> to vector<8x1xf32>
    %cst_3 = arith.constant 0.001953125 : f32
    %6 = vector.broadcast %cst_3 : f32 to vector<8x1xf32>
    %7 = arith.mulf %5, %6 : vector<8x1xf32>
    %8 = arith.mulf %4, %4 : vector<8x1xf32>
    %9 = arith.subf %7, %8 : vector<8x1xf32>
    %cst_4 = arith.constant 0.000000e+00 : f32
    %10 = vector.broadcast %cst_4 : f32 to vector<8x1xf32>
    %11 = arith.maximumf %9, %10 : vector<8x1xf32>
    %c0_5 = arith.constant 0 : index
    %c0_6 = arith.constant 0 : index
    %12 = vector.load %arg4[%c0_5, %c0_6] : memref<8x2xf32, #tpu.memory_space<vmem>>, vector<8x1xf32>
    %cst_7 = arith.constant 9.99999974E-6 : f32
    %13 = vector.broadcast %cst_7 : f32 to vector<8x1xf32>
    %14 = arith.addf %11, %13 : vector<8x1xf32>
    %15 = math.rsqrt %14 : vector<8x1xf32>
    %16 = arith.mulf %12, %15 : vector<8x1xf32>
    %c0_8 = arith.constant 0 : index
    %c1 = arith.constant 1 : index
    %17 = vector.load %arg4[%c0_8, %c1] : memref<8x2xf32, #tpu.memory_space<vmem>>, vector<8x1xf32>
    %18 = arith.mulf %4, %16 : vector<8x1xf32>
    %19 = arith.subf %17, %18 : vector<8x1xf32>
    %c0_9 = arith.constant 0 : index
    %c0_10 = arith.constant 0 : index
    %c0_11 = arith.constant 0 : index
    %20 = vector.load %arg1[%c0_9, %c0_10, %c0_11] : memref<1x8x256xf32, #tpu.memory_space<vmem>>, vector<1x8x256xf32>
    %21 = vector.shape_cast %20 : vector<1x8x256xf32> to vector<8x256xf32>
    %22 = vector.broadcast %16 : vector<8x1xf32> to vector<8x256xf32>
    %23 = arith.mulf %21, %22 : vector<8x256xf32>
    %24 = vector.broadcast %19 : vector<8x1xf32> to vector<8x256xf32>
    %25 = arith.addf %23, %24 : vector<8x256xf32>
    %cst_12 = arith.constant 0.000000e+00 : f32
    %26 = vector.broadcast %cst_12 : f32 to vector<8x256xf32>
    %27 = arith.maximumf %25, %26 : vector<8x256xf32>
    %c0_13 = arith.constant 0 : index
    %c0_14 = arith.constant 0 : index
    %28 = vector.load %arg5[%c0_13, %c0_14] : memref<32x8xbf16, #tpu.memory_space<vmem>>, vector<32x8xbf16>
    %29 = arith.truncf %27 : vector<8x256xf32> to vector<8x256xbf16>
    %cst_15 = arith.constant dense<0.000000e+00> : vector<32x256xf32>
    %30 = tpu.matmul %28, %29, %cst_15 {dimension_numbers = #tpu.dot_dimension_numbers<[1], [0], [0], [1], [0, 0, 1, 1], [], []>} : vector<32x8xbf16>, vector<8x256xbf16>, vector<32x256xf32> -> vector<32x256xf32>
    %c0_16 = arith.constant 0 : index
    %c0_17 = arith.constant 0 : index
    %31 = vector.load %arg6[%c0_16, %c0_17] : memref<32x1xf32, #tpu.memory_space<vmem>>, vector<32x1xf32>
    %32 = vector.broadcast %31 : vector<32x1xf32> to vector<32x256xf32>
    %33 = arith.addf %30, %32 : vector<32x256xf32>
    %c0_18 = arith.constant 0 : index
    %c0_19 = arith.constant 0 : index
    %c0_20 = arith.constant 0 : index
    %34 = vector.load %arg2[%c0_18, %c0_19, %c0_20] : memref<1x32x256xf32, #tpu.memory_space<vmem>>, vector<1x32x256xf32>
    %35 = vector.shape_cast %34 : vector<1x32x256xf32> to vector<32x256xf32>
    %36 = arith.addf %33, %35 : vector<32x256xf32>
    %c0_21 = arith.constant 0 : index
    %c0_22 = arith.constant 0 : index
    %c0_23 = arith.constant 0 : index
    %37 = vector.load %arg7[%c0_21, %c0_22, %c0_23] : memref<1x32x256xf32, #tpu.memory_space<vmem>>, vector<1x32x256xf32>
    %38 = vector.shape_cast %37 : vector<1x32x256xf32> to vector<32x256xf32>
    %39 = vector.shape_cast %36 : vector<32x256xf32> to vector<1x32x256xf32>
    tpu.vector_store %arg7[%c0_21, %c0_22, %c0_23], %39 {strides = array<i32>} : memref<1x32x256xf32, #tpu.memory_space<vmem>>, vector<1x32x256xf32>,
    return
  }
  func.func @transform_0(%arg0: i32) -> (i32, i32, i32) {
    %c0_i32 = arith.constant 0 : i32
    %c0_i32_0 = arith.constant 0 : i32
    %c0_i32_1 = arith.constant 0 : i32
    return %arg0, %c0_i32, %c0_i32_0 : i32, i32, i32
  }
  func.func @transform_1(%arg0: i32) -> (i32, i32, i32) {
    %c0_i32 = arith.constant 0 : i32
    %c0_i32_0 = arith.constant 0 : i32
    %c0_i32_1 = arith.constant 0 : i32
    return %arg0, %c0_i32, %c0_i32_0 : i32, i32, i32
  }
  func.func @transform_2(%arg0: i32) -> (i32, i32, i32) {
    %c0_i32 = arith.constant 0 : i32
    %c0_i32_0 = arith.constant 0 : i32
    %c0_i32_1 = arith.constant 0 : i32
    %c0_i32_2 = arith.constant 0 : i32
    return %c0_i32, %c0_i32_0, %c0_i32_1 : i32, i32, i32
  }
  func.func @transform_3(%arg0: i32) -> (i32, i32) {
    %c0_i32 = arith.constant 0 : i32
    %c0_i32_0 = arith.constant 0 : i32
    %c0_i32_1 = arith.constant 0 : i32
    return %c0_i32, %c0_i32_0 : i32, i32
  }
  func.func @transform_4(%arg0: i32) -> (i32, i32) {
    %c0_i32 = arith.constant 0 : i32
    %c0_i32_0 = arith.constant 0 : i32
    %c0_i32_1 = arith.constant 0 : i32
    return %c0_i32, %c0_i32_0 : i32, i32
  }
  func.func @transform_5(%arg0: i32) -> (i32, i32) {
    %c0_i32 = arith.constant 0 : i32
    %c0_i32_0 = arith.constant 0 : i32
    %c0_i32_1 = arith.constant 0 : i32
    return %c0_i32, %c0_i32_0 : i32, i32
  }
  func.func @transform_6(%arg0: i32) -> (i32, i32, i32) {
    %c0_i32 = arith.constant 0 : i32
    %c0_i32_0 = arith.constant 0 : i32
    %c0_i32_1 = arith.constant 0 : i32
    return %arg0, %c0_i32, %c0_i32_0 : i32, i32, i32
  }
}

module attributes {stable_mosaic.version = 11 : i64} {
  func.func @_stage1_kernel(%arg0: i32, %arg1: memref<1x32x256xf32, #tpu.memory_space<vmem>>, %arg2: memref<32x2xf32, #tpu.memory_space<vmem>>, %arg3: memref<32x16xbf16, #tpu.memory_space<vmem>>, %arg4: memref<1x16xf32, #tpu.memory_space<vmem>>, %arg5: memref<1x8x256xf32, #tpu.memory_space<vmem>>, %arg6: memref<1x8x2xf32, #tpu.memory_space<vmem>>) attributes {dimension_semantics = [#tpu.dimension_semantics<parallel>], iteration_bounds = array<i64: 2>, scalar_prefetch = 0 : i64, scratch_operands = 0 : i64, tpu.core_type = #tpu.core_type<tc>, window_params = [{transform_indices = @transform_0, window_bounds = array<i64: 1, 32, 256>}, {pipeline_mode = #tpu.pipeline_mode<synchronous>, transform_indices = @transform_1, window_bounds = array<i64: 32, 2>}, {pipeline_mode = #tpu.pipeline_mode<synchronous>, transform_indices = @transform_2, window_bounds = array<i64: 32, 16>}, {pipeline_mode = #tpu.pipeline_mode<synchronous>, transform_indices = @transform_3, window_bounds = array<i64: 1, 16>}, {transform_indices = @transform_4, window_bounds = array<i64: 1, 8, 256>}, {transform_indices = @transform_5, window_bounds = array<i64: 1, 8, 2>}]} {
    %c0 = arith.constant 0 : index
    %c0_0 = arith.constant 0 : index
    %c0_1 = arith.constant 0 : index
    %0 = vector.load %arg1[%c0, %c0_0, %c0_1] : memref<1x32x256xf32, #tpu.memory_space<vmem>>, vector<1x32x256xf32>
    %1 = vector.shape_cast %0 : vector<1x32x256xf32> to vector<32x256xf32>
    %c0_2 = arith.constant 0 : index
    %c0_3 = arith.constant 0 : index
    %2 = vector.load %arg2[%c0_2, %c0_3] : memref<32x2xf32, #tpu.memory_space<vmem>>, vector<32x1xf32>
    %c0_4 = arith.constant 0 : index
    %c1 = arith.constant 1 : index
    %3 = vector.load %arg2[%c0_4, %c1] : memref<32x2xf32, #tpu.memory_space<vmem>>, vector<32x1xf32>
    %4 = vector.broadcast %2 : vector<32x1xf32> to vector<32x256xf32>
    %5 = arith.mulf %1, %4 : vector<32x256xf32>
    %6 = vector.broadcast %3 : vector<32x1xf32> to vector<32x256xf32>
    %7 = arith.addf %5, %6 : vector<32x256xf32>
    %cst = arith.constant 0.000000e+00 : f32
    %8 = vector.broadcast %cst : f32 to vector<32x256xf32>
    %9 = arith.maximumf %7, %8 : vector<32x256xf32>
    %10 = arith.truncf %9 : vector<32x256xf32> to vector<32x256xbf16>
    %c0_5 = arith.constant 0 : index
    %c0_6 = arith.constant 0 : index
    %11 = vector.load %arg3[%c0_5, %c0_6] : memref<32x16xbf16, #tpu.memory_space<vmem>>, vector<32x16xbf16>
    %cst_7 = arith.constant dense<0.000000e+00> : vector<256x16xf32>
    %12 = tpu.matmul %10, %11, %cst_7 {dimension_numbers = #tpu.dot_dimension_numbers<[0], [0], [1], [1], [0, 1, 1, 1], [], []>} : vector<32x256xbf16>, vector<32x16xbf16>, vector<256x16xf32> -> vector<256x16xf32>
    %c0_8 = arith.constant 0 : index
    %c0_9 = arith.constant 0 : index
    %13 = vector.load %arg4[%c0_8, %c0_9] : memref<1x16xf32, #tpu.memory_space<vmem>>, vector<1x16xf32>
    %14 = vector.broadcast %13 : vector<1x16xf32> to vector<256x16xf32>
    %15 = arith.addf %12, %14 : vector<256x16xf32>
    %16 = vector.extract_strided_slice %15 {offsets = [0, 0], sizes = [256, 4], strides = [1, 1]} : vector<256x16xf32> to vector<256x4xf32>
    %17 = vector.extract_strided_slice %15 {offsets = [0, 4], sizes = [256, 12], strides = [1, 1]} : vector<256x16xf32> to vector<256x12xf32>
    %18 = vector.shape_cast %17 : vector<256x12xf32> to vector<128x2x12xf32>
    %cst_10 = arith.constant dense<0xFF800000> : vector<128x12xf32>
    %19 = vector.multi_reduction <maximumf>, %18, %cst_10 [1] : vector<128x2x12xf32> to vector<128x12xf32>
    %20 = vector.shape_cast %19 : vector<128x12xf32> to vector<8x16x12xf32>
    %21 = vector.extract_strided_slice %20 {offsets = [0, 0, 0], sizes = [8, 8, 12], strides = [1, 1, 1]} : vector<8x16x12xf32> to vector<8x8x12xf32>
    %22 = vector.extract_strided_slice %20 {offsets = [0, 8, 0], sizes = [8, 8, 12], strides = [1, 1, 1]} : vector<8x16x12xf32> to vector<8x8x12xf32>
    %23 = arith.maximumf %21, %22 : vector<8x8x12xf32>
    %24 = vector.shape_cast %23 : vector<8x8x12xf32> to vector<64x12xf32>
    %25 = vector.extract_strided_slice %24 {offsets = [0, 0], sizes = [64, 4], strides = [1, 1]} : vector<64x12xf32> to vector<64x4xf32>
    %26 = vector.extract_strided_slice %24 {offsets = [0, 4], sizes = [64, 8], strides = [1, 1]} : vector<64x12xf32> to vector<64x8xf32>
    %cst_11 = arith.constant dense<0.000000e+00> : vector<8x4xf32>
    %27 = tpu.matmul %26, %25, %cst_11 {dimension_numbers = #tpu.dot_dimension_numbers<[0], [0], [1], [1], [0, 1, 1, 1], [], []>} : vector<64x8xf32>, vector<64x4xf32>, vector<8x4xf32> -> vector<8x4xf32>
    %cst_12 = arith.constant 1.562500e-02 : f32
    %28 = vector.broadcast %cst_12 : f32 to vector<8x4xf32>
    %29 = arith.mulf %27, %28 : vector<8x4xf32>
    %cst_13 = arith.constant dense<0.000000e+00> : vector<8x256xf32>
    %30 = tpu.matmul %29, %16, %cst_13 {dimension_numbers = #tpu.dot_dimension_numbers<[1], [1], [0], [0], [0, 0, 1, 0], [], []>} : vector<8x4xf32>, vector<256x4xf32>, vector<8x256xf32> -> vector<8x256xf32>
    %c0_14 = arith.constant 0 : index
    %c0_15 = arith.constant 0 : index
    %c0_16 = arith.constant 0 : index
    %31 = vector.load %arg5[%c0_14, %c0_15, %c0_16] : memref<1x8x256xf32, #tpu.memory_space<vmem>>, vector<1x8x256xf32>
    %32 = vector.shape_cast %31 : vector<1x8x256xf32> to vector<8x256xf32>
    %33 = vector.shape_cast %30 : vector<8x256xf32> to vector<1x8x256xf32>
    tpu.vector_store %arg5[%c0_14, %c0_15, %c0_16], %33 {strides = array<i32>} : memref<1x8x256xf32, #tpu.memory_space<vmem>>, vector<1x8x256xf32>,
    %cst_17 = arith.constant dense<0.000000e+00> : vector<8xf32>
    %34 = vector.multi_reduction <add>, %30, %cst_17 [1] : vector<8x256xf32> to vector<8xf32>
    %35 = vector.shape_cast %34 : vector<8xf32> to vector<8x1xf32>
    %36 = arith.mulf %30, %30 : vector<8x256xf32>
    %cst_18 = arith.constant dense<0.000000e+00> : vector<8xf32>
    %37 = vector.multi_reduction <add>, %36, %cst_18 [1] : vector<8x256xf32> to vector<8xf32>
    %38 = vector.shape_cast %37 : vector<8xf32> to vector<8x1xf32>
    %39 = tpu.concatenate %35, %38 in 1 : vector<8x1xf32>, vector<8x1xf32> -> vector<8x2xf32>
    %c0_19 = arith.constant 0 : index
    %c0_20 = arith.constant 0 : index
    %c0_21 = arith.constant 0 : index
    %40 = vector.load %arg6[%c0_19, %c0_20, %c0_21] : memref<1x8x2xf32, #tpu.memory_space<vmem>>, vector<1x8x2xf32>
    %41 = vector.shape_cast %40 : vector<1x8x2xf32> to vector<8x2xf32>
    %42 = vector.shape_cast %39 : vector<8x2xf32> to vector<1x8x2xf32>
    tpu.vector_store %arg6[%c0_19, %c0_20, %c0_21], %42 {strides = array<i32>} : memref<1x8x2xf32, #tpu.memory_space<vmem>>, vector<1x8x2xf32>,
    return
  }
  func.func @transform_0(%arg0: i32) -> (i32, i32, i32) {
    %c0_i32 = arith.constant 0 : i32
    %c0_i32_0 = arith.constant 0 : i32
    %c0_i32_1 = arith.constant 0 : i32
    return %arg0, %c0_i32, %c0_i32_0 : i32, i32, i32
  }
  func.func @transform_1(%arg0: i32) -> (i32, i32) {
    %c0_i32 = arith.constant 0 : i32
    %c0_i32_0 = arith.constant 0 : i32
    %c0_i32_1 = arith.constant 0 : i32
    return %c0_i32, %c0_i32_0 : i32, i32
  }
  func.func @transform_2(%arg0: i32) -> (i32, i32) {
    %c0_i32 = arith.constant 0 : i32
    %c0_i32_0 = arith.constant 0 : i32
    %c0_i32_1 = arith.constant 0 : i32
    return %c0_i32, %c0_i32_0 : i32, i32
  }
  func.func @transform_3(%arg0: i32) -> (i32, i32) {
    %c0_i32 = arith.constant 0 : i32
    %c0_i32_0 = arith.constant 0 : i32
    %c0_i32_1 = arith.constant 0 : i32
    return %c0_i32, %c0_i32_0 : i32, i32
  }
  func.func @transform_4(%arg0: i32) -> (i32, i32, i32) {
    %c0_i32 = arith.constant 0 : i32
    %c0_i32_0 = arith.constant 0 : i32
    %c0_i32_1 = arith.constant 0 : i32
    return %arg0, %c0_i32, %c0_i32_0 : i32, i32, i32
  }
  func.func @transform_5(%arg0: i32) -> (i32, i32, i32) {
    %c0_i32 = arith.constant 0 : i32
    %c0_i32_0 = arith.constant 0 : i32
    %c0_i32_1 = arith.constant 0 : i32
    return %arg0, %c0_i32, %c0_i32_0 : i32, i32, i32
  }
}

</mosaic_0001>

<bundles_post_ra>
// kernel: nl_block_forward.3
= control target key start
LH: loop header
LB: loop body
LE: loop exit
PB: predicated region body
PF: predicated region fallthrough
CT: control target
= control target key end

     0   :  { %s606_s21 = smov 0   ;;  %s661_s0 = inlined_call_operand.vmem [shape: f32[2,8,256], index: 0, kind: input, shape index: {}]   ;;  %s662_s1 = inlined_call_operand.vmem [shape: f32[2,32,256], index: 1, kind: input, shape index: {}, may-alias: {1,6}]   ;;  %s663_s2 = inlined_call_operand.vmem [shape: f32[2,8,2], index: 2, kind: input, shape index: {}]   ;;  %s664_s3 = inlined_call_operand.vmem [shape: f32[8,2], index: 3, kind: input, shape index: {}]   ;;  %s665_s4 = inlined_call_operand.vmem [shape: bf16[32,8], index: 4, kind: input, shape index: {}]   ;;  %s666_s5 = inlined_call_operand.vmem [shape: f32[32,1], index: 5, kind: input, shape index: {}]   ;;  %s667_s6 = inlined_call_operand.vmem [shape: f32[2,32,256], index: 6, kind: output, shape index: {}, may-alias: {1,6}]  }
   0x1 LB: > { %s517_s22 = sadd.s32 4294967295, %s565_s21   ;;  %p521_p0 = scmp.ge.s32.totalorder %s565_s21, 1  ;;  %s565_s21 = sphi %s606_s21, %s16_s21  }
   0x2   : > { %p222_p1 = scmp.lt.s32.totalorder %s565_s21, 3 }
   0x4   : > { %p223_p2 = pnand %p521_p0, %p222_p1 }
   0x5   : > { %v273_v0 = vld [vmem:[%s663_s2] sm:$0xff] (!%p223_p2)  ;;  %v274_v1 = vld [vmem:[%s663_s2 + $0x8] sm:$0xff] (!%p223_p2)  ;;  %vm275_vm0 = vcmask (!%p223_p2), 15360   ;;  %s567_s27 = smov (!%p223_p2), 1   ;;  %v568_v11 = vmov (!%p223_p2), 0   ;;  %s569_s28 = smov (!%p223_p2), 127  }
   0x6   : > { %226 = sbr.rel (%p223_p2) target bundleno = 739 (0x2e3), region = 44  ;;  %v276_v2 = vsel (!%p223_p2), %vm275_vm0, %v273_v0, 0.0  ;;  %v277_v3 = vsel (!%p223_p2), %vm275_vm0, %v274_v1, 0.0  ;;  %552 = vset.pattern.permute.xlu1 (!%p223_p2), %v568_v11  ;;  %405 = vmatprep.mubr.bf16.mxu0 (!%p223_p2), %v568_v11  ;;  %v570_v13 = vmov (!%p223_p2), 1   ;;  %v287_v14 = vld [vmem:[%s664_s3] sm:$0xff] (!%p223_p2)  ;;  %v326_v19 = vld [vmem:[%s666_s5 + $0x8] sm:$0xff] (!%p223_p2) }
   0x7   : > { %v278_v4 = vadd.f32 (!%p223_p2), %v277_v3, %v276_v2  ;;  %415 = vmatprep.mubr.bf16.mxu1 (!%p223_p2), %v568_v11  ;;  %553 = vset.pattern.permute.xlu0 (!%p223_p2), %v570_v13  ;;  %v325_v18 = vld [vmem:[%s666_s5] sm:$0xff] (!%p223_p2)  ;;  %v328_v20 = vld [vmem:[%s666_s5 + $0x18] sm:$0xff] (!%p223_p2)  ;;  %v327_v23 = vld [vmem:[%s666_s5 + $0x10] sm:$0xff] (!%p223_p2)  ;;  %p257_p3 = scmp.lt.s32.totalorder (!%p223_p2), %s517_s22, 1  ;;  %vm366_vm1 = vcmask (!%p223_p2), 1043456   ;;  %vm359_vm2 = vcmask (!%p223_p2), 64512  }
   0x8   : > { %v555_v37 = vld [vmem:[%s665_s4] sm:$0xff] (!%p223_p2)   ;;  %v556_v38 = vld [vmem:[%s665_s4 + $0x8] sm:$0xff] (!%p223_p2)  }
   0x9   : > { %v279_v5 = vmul.f32 (!%p223_p2), 0.001953125, %v278_v4 }
   0xb   : > { %v280_v6 = vmul.f32 (!%p223_p2), %v279_v5, %v279_v5 }
   0xd   : > { %282 = vrot.lane.b32.xlu0 %v280_v6, %s567_s27  ;;  %s669_s22 = smov (!%p257_p3, %s517_s22), 1 }
   0xe   : > { %s535_s15 = sshll.u32 %s669_s22, 4  ;;  %s536_s25 = sshll.u32 %s669_s22, 6 }
   0xf   : > { %s261_s18 = scalar_lea.vmem %s661_s0, %s535_s15  ;;  %s271_s22 = scalar_lea.vmem %s667_s6, %s536_s25 }
  0x10   : > { %v301_v25 = vld [vmem:[%s261_s18] sm:$0xff]  ;;  %v302_v26 = vld [vmem:[%s261_s18 + $0x8] sm:$0xff] }
  0x7f   : > { %v283_v7 = vpop.permute.xlu0 %282 }
  0x80   : > { %v285_v8 = vsub.f32 %v279_v5, %v283_v7 }
  0x82   : > { %v286_v9 = vmax.f32 %v285_v8, 0.0 }
  0x84   : > { %v288_v10 = vadd.f32 1e-05, %v286_v9 }
  0x86   : > { %557 = vrsqrt.f32 %v288_v10 }
  0x90   : > { %v558_v12 = vpop.eup %557 }
  0x91   : > { %291 = vrot.lane.b32.xlu0 %v558_v12, %s569_s28  ;;  %s266_s28 = scalar_lea.vmem %s662_s1, %s536_s25 }
  0x92   : > { %v426_v44 = vld [vmem:[%s266_s28] sm:$0xff]  ;;  %v427_v50 = vld [vmem:[%s266_s28 + $0x8] sm:$0xff]  ;;  %v428_v53 = vld [vmem:[%s266_s28 + $0x10] sm:$0xff] }
  0x93   : > { %v430_v46 = vld [vmem:[%s266_s28 + $0x20] sm:$0xff]  ;;  %v431_v52 = vld [vmem:[%s266_s28 + $0x28] sm:$0xff]  ;;  %v432_v58 = vld [vmem:[%s266_s28 + $0x30] sm:$0xff] }
  0x94   : > { %v429_v59 = vld [vmem:[%s266_s28 + $0x18] sm:$0xff] }
  0x95   : > { %v433_v60 = vld [vmem:[%s266_s28 + $0x38] sm:$0xff] }
 0x103   : > { %v292_v15 = vpop.permute.xlu0 %291 }
 0x104   : > { %v294_v16 = vmul.f32 %v292_v15, %v287_v14 }
 0x106   : > { %v295_v17 = vmul.f32 %v294_v16, %v279_v5 }
 0x108   : > { %297 = vrot.lane.b32.xlu1 %v295_v17, %s567_s27 }
 0x10c   : > { %305 = vperm.xlu1 %552, %v294_v16  }
 0x110   : > { %331 = vperm.xlu1 %552, %v325_v18  }
 0x114   : > { %336 = vperm.xlu1 %552, %v326_v19  }
 0x118   : > { %346 = vperm.xlu1 %552, %v328_v20  }
 0x17a   : > { %v298_v21 = vpop.permute.xlu1 %297 }
 0x17b   : > { %v300_v22 = vsub.f32 %v287_v14, %v298_v21 }
 0x17d   : > { %312 = vperm.xlu0 %553, %v300_v22  }
 0x181   : > { %554 = vset.pattern.permute.xlu0 %v568_v11 }
 0x182   : > { %341 = vperm.xlu0 %554, %v327_v23  }
 0x18b   : > { %v306_v24 = vpop.permute.xlu1 %305 }
 0x18c   : > { %v308_v27 = vmul.f32 %v306_v24, %v301_v25  ;;  %v309_v28 = vmul.f32 %v306_v24, %v302_v26 }
 0x18f   : > { %v332_v39 = vpop.permute.xlu1 %331 }
 0x193   : > { %v337_v40 = vpop.permute.xlu1 %336 }
 0x197   : > { %v347_v42 = vpop.permute.xlu1 %346 }
 0x1fc   : > { %v313_v29 = vpop.permute.xlu0 %312 }
 0x1fd   : > { %v315_v30 = vadd.f32 %v313_v29, %v308_v27  ;;  %v316_v31 = vadd.f32 %v313_v29, %v309_v28 }
 0x1ff   : > { %v317_v32 = vmax.f32 %v315_v30, 0.0  ;;  %v318_v33 = vmax.f32 %v316_v31, 0.0 }
 0x201   : > { %v324_v34 = vpack.c.bf16 %v318_v33, %v318_v33  ;;  %v323_v35 = vpack.c.bf16 %v317_v32, %v317_v32  ;;  %v342_v41 = vpop.permute.xlu0 %341 }
 0x203   : > { %530 = vmatprep.subr.msk.bf16.mxu0 %vm366_vm1, %v324_v34  ;;  %538 = vmatprep.subr.msk.bf16.mxu1 %vm366_vm1, %v324_v34  ;;  %v368_v36 = vsel %vm366_vm1, %v323_v35, 0 }
 0x204   : > { %374 = vmatpush1.bf16.msra.mxu0 %v368_v36  ;;  %539 = vmatpush1.bf16.msra.mxu1 %v368_v36 }
 0x207   : > { %531 = vmatmul.mubr.msk.bf16.vlgmr.msra.gmra.mrb[0].mxu0 %vm359_vm2, %v555_v37  ;;  %532 = vmatmul.mubr.msk.bf16.vlgmr.msra.gmra.mrb[0].mxu1 %vm359_vm2, %v556_v38 }
 0x2da   : > { %v407_v43 = vpop.f32.mrb[0].mxu0  ;;  %v417_v45 = vpop.f32.mrb[0].mxu1 }
 0x2db   : > { %v408_v47 = vadd.f32 %v407_v43, %v332_v39  ;;  %v418_v48 = vadd.f32 %v417_v45, %v342_v41  ;;  %v409_v49 = vpop.f32.mrb[1].mxu0  ;;  %v419_v51 = vpop.f32.mrb[1].mxu1 }
 0x2dc   : > { %v410_v54 = vadd.f32 %v409_v49, %v332_v39  ;;  %v420_v55 = vadd.f32 %v419_v51, %v342_v41  ;;  %v411_v56 = vpop.f32.mrb[2].mxu0  ;;  %v421_v57 = vpop.f32.mrb[2].mxu1 }
 0x2dd   : > { %v434_v61 = vadd.f32 %v426_v44, %v408_v47  ;;  %v438_v62 = vadd.f32 %v430_v46, %v418_v48  ;;  %v412_v63 = vadd.f32 %v411_v56, %v337_v40  ;;  %v422_v0 = vadd.f32 %v421_v57, %v347_v42  ;;  %v413_v1 = vpop.f32.mrb[3].mxu0  ;;  %v423_v2 = vpop.f32.mrb[3].mxu1 }
 0x2de   : > { %v435_v3 = vadd.f32 %v427_v50, %v410_v54  ;;  %v439_v4 = vadd.f32 %v431_v52, %v420_v55  ;;  %v414_v5 = vadd.f32 %v413_v1, %v337_v40  ;;  %v424_v6 = vadd.f32 %v423_v2, %v347_v42 }
 0x2df   : > { %v436_v7 = vadd.f32 %v428_v53, %v412_v63  ;;  %v440_v8 = vadd.f32 %v432_v58, %v422_v0  ;;  %442 = vst [vmem:[%s271_s22] sm:$0xff] %v434_v61  ;;  %446 = vst [vmem:[%s271_s22 + $0x20] sm:$0xff] %v438_v62 }
 0x2e0   : > { %v437_v9 = vadd.f32 %v429_v59, %v414_v5  ;;  %v441_v10 = vadd.f32 %v433_v60, %v424_v6  ;;  %443 = vst [vmem:[%s271_s22 + $0x8] sm:$0xff] %v435_v3  ;;  %447 = vst [vmem:[%s271_s22 + $0x28] sm:$0xff] %v439_v4 }
 0x2e1   : > { %444 = vst [vmem:[%s271_s22 + $0x10] sm:$0xff] %v436_v7  ;;  %448 = vst [vmem:[%s271_s22 + $0x30] sm:$0xff] %v440_v8 }
 0x2e2   : > { %445 = vst [vmem:[%s271_s22 + $0x18] sm:$0xff] %v437_v9  ;;  %449 = vst [vmem:[%s271_s22 + $0x38] sm:$0xff] %v441_v10 }
 0x2e3 PF: > { %s16_s21 = sadd.s32 1, %s565_s21  }
 0x2e4   : > { %p13_p4 = scmp.ge.s32.totalorder %s16_s21, 4  }
 0x2e6   :  { %15 = sbr.rel (!%p13_p4) target bundleno = 1 (0x1), region = 77 }

// kernel: nl_block_forward.2
= control target key start
LH: loop header
LB: loop body
LE: loop exit
PB: predicated region body
PF: predicated region fallthrough
CT: control target
= control target key end

     0   :  { %s3096_s18 = smov 0   ;;  %s4389_s0 = inlined_call_operand.vmem [shape: f32[2,32,256], index: 0, kind: input, shape index: {}]   ;;  %s4390_s1 = inlined_call_operand.vmem [shape: f32[32,2], index: 1, kind: input, shape index: {}]   ;;  %s4391_s2 = inlined_call_operand.vmem [shape: bf16[32,16], index: 2, kind: input, shape index: {}]   ;;  %s4392_s3 = inlined_call_operand.vmem [shape: f32[1,16], index: 3, kind: input, shape index: {}]   ;;  %s4393_s4 = inlined_call_operand.vmem [shape: f32[2,8,256], index: 4, kind: output, shape index: {0}]   ;;  %s4394_s5 = inlined_call_operand.vmem [shape: f32[2,8,2], index: 5, kind: output, shape index: {1}]  }
   0x1 LB: > { %s2764_s19 = sadd.s32 4294967295, %s3056_s18   ;;  %p2768_p0 = scmp.ge.s32.totalorder %s3056_s18, 1  ;;  %s3056_s18 = sphi %s3096_s18, %s16_s18  }
   0x2   : > { %p190_p1 = scmp.lt.s32.totalorder %s3056_s18, 3 }
   0x4   : > { %p191_p2 = pnand %p2768_p0, %p190_p1 }
   0x6   : > { %194 = sbr.rel (%p191_p2) target bundleno = 1589 (0x635), region = 36 }
   0xd   : > { %v247_v0 = vld [vmem:[%s4390_s1 + $0x10] sm:$0xff]  ;;  %v245_v1 = vld [vmem:[%s4390_s1] sm:$0xff]  ;;  %v3058_v2 = vmov 0   ;;  %v248_v3 = vld [vmem:[%s4390_s1 + $0x18] sm:$0xff]  ;;  %v3059_v5 = vmov 1   ;;  %p222_p3 = scmp.lt.s32.totalorder %s2764_s19, 1 }
   0xe   : > { %3024 = vset.pattern.permute.xlu1 %v3058_v2  ;;  %3023 = vset.pattern.permute.xlu0 %v3058_v2  ;;  %v246_v4 = vld [vmem:[%s4390_s1 + $0x8] sm:$0xff]  ;;  %v3047_v6 = vld [vmem:[%s4391_s2] sm:$0xff]   ;;  %vm368_vm0 = vcmask 261120   ;;  %vm1282_vm1 = vcmask 123936   ;;  %vm2307_vm2 = vcmask 1041409   ;;  %vm2309_vm3 = vcmask 1042434  }
   0xf   : > { %261 = vperm.xlu1 %3024, %v247_v0   ;;  %251 = vperm.xlu0 %3023, %v245_v1   ;;  %v3048_v7 = vld [vmem:[%s4391_s2 + $0x8] sm:$0xff]   ;;  %s4662_s19 = smov (!%p222_p3, %s2764_s19), 1  ;;  %vm2311_vm4 = vcmask 1043459   ;;  %vm2313_vm5 = vcmask 1044484   ;;  %vm2315_vm6 = vcmask 1045509   ;;  %vm2317_vm7 = vcmask 1046534  }
  0x10   : > { %2892 = vmatprep.subr.bf16.mxu0 %v3047_v6  ;;  %s2829_s7 = sshll.u32 %s4662_s19, 6  ;;  %vm2319_vm8 = vcmask 1047559   ;;  %s3061_s15 = smov 120   ;;  %vm2525_vm9 = vcmask 31744   ;;  %vm3064_vm11 = vmmov 0   ;;  %vm2450_vm12 = vcmask 523264  }
  0x11   : > { %2893 = vmatpush3.bf16.msra.mxu0 %v3047_v6  ;;  %s226_s10 = scalar_lea.vmem %s4389_s0, %s2829_s7  ;;  %v614_v6 = vlaneseq  ;;  %vm3775_vm10 = vmpackc.low %vm2525_vm9, %vm2525_vm9  ;;  %s3063_s16 = smov 124   ;;  %vm2674_vm13 = vcmask 7168   ;;  %vm2676_vm14 = vcmask 15360  }
  0x12   : > { %2894 = vmatprep.subr.bf16.mxu0 %v3048_v7  ;;  %v237_v10 = vld [vmem:[%s226_s10] sm:$0xff]  ;;  %v238_v13 = vld [vmem:[%s226_s10 + $0x8] sm:$0xff]  ;;  %v239_v14 = vld [vmem:[%s226_s10 + $0x10] sm:$0xff]  ;;  %s2830_s17 = sshll.u32 %s4662_s19, 4  ;;  %s2773_s23 = sshll.u32 %s4662_s19, 3 }
  0x13   : > { %266 = vperm.xlu1 %3024, %v248_v3   ;;  %256 = vperm.xlu0 %3023, %v246_v4   ;;  %v240_v15 = vld [vmem:[%s226_s10 + $0x18] sm:$0xff]  ;;  %v241_v16 = vld [vmem:[%s226_s10 + $0x20] sm:$0xff]  ;;  %v242_v17 = vld [vmem:[%s226_s10 + $0x28] sm:$0xff]  ;;  %s231_s22 = scalar_lea.vmem %s4393_s4, %s2830_s17  ;;  %s235_s26 = scalar_lea.vmem %s4394_s5, %s2773_s23 }
  0x14   : > { %v243_v20 = vld [vmem:[%s226_s10 + $0x30] sm:$0xff]  ;;  %v244_v21 = vld [vmem:[%s226_s10 + $0x38] sm:$0xff] }
  0x15   : > { %2895 = vmatpush3.bf16.msra.mxu0 %v3048_v7 }
  0x17   : > { %3026 = vset.pattern.permute.xlu1 %v3059_v5  ;;  %3025 = vset.pattern.permute.xlu0 %v3059_v5 }
  0x18   : > { %282 = vperm.xlu1 %3026, %v246_v4   ;;  %278 = vperm.xlu0 %3025, %v245_v1   ;;  %v3060_v4 = vmov 1983009808  }
  0x19   : > { %v612_v5 = vunpack.c.l.s4 %v3060_v4 }
  0x1b   : > { %v613_v7 = vunpack.c.0.s8 %v612_v5 }
  0x1c   : > { %286 = vperm.xlu1 %3026, %v247_v0   ;;  %290 = vperm.xlu0 %3025, %v248_v3  }
  0x8e   : > { %v262_v8 = vpop.permute.xlu1 %261  ;;  %v252_v9 = vpop.permute.xlu0 %251 }
  0x8f   : > { %v269_v18 = vmul.f32 %v252_v9, %v237_v10  ;;  %v270_v19 = vmul.f32 %v252_v9, %v238_v13  ;;  %v273_v30 = vmul.f32 %v262_v8, %v241_v16  ;;  %v274_v31 = vmul.f32 %v262_v8, %v242_v17  ;;  %v3151_v9 = vld [vmem:[%s4392_s3] ss:$0 sm:$0xff] }
  0x90   : > { %v615_v8 = vshrl.u32 %v614_v6, 7 }
  0x92   : > { %v267_v11 = vpop.permute.xlu1 %266  ;;  %v257_v12 = vpop.permute.xlu0 %256  ;;  %v3153_v10 = vsub.s32 %v613_v7, %v615_v8 }
  0x93   : > { %v271_v22 = vmul.f32 %v257_v12, %v239_v14  ;;  %v272_v23 = vmul.f32 %v257_v12, %v240_v15  ;;  %v275_v32 = vmul.f32 %v267_v11, %v243_v20  ;;  %v276_v33 = vmul.f32 %v267_v11, %v244_v21 }
  0x97   : > { %v283_v24 = vpop.permute.xlu1 %282  ;;  %v279_v25 = vpop.permute.xlu0 %278 }
  0x98   : > { %v295_v26 = vadd.f32 %v283_v24, %v271_v22  ;;  %v296_v27 = vadd.f32 %v283_v24, %v272_v23  ;;  %v293_v28 = vadd.f32 %v279_v25, %v269_v18  ;;  %v294_v29 = vadd.f32 %v279_v25, %v270_v19 }
  0x9a   : > { %v303_v34 = vmax.f32 %v295_v26, 0.0  ;;  %v304_v35 = vmax.f32 %v296_v27, 0.0  ;;  %v301_v36 = vmax.f32 %v293_v28, 0.0  ;;  %v302_v37 = vmax.f32 %v294_v29, 0.0 }
  0x9b   : > { %v287_v38 = vpop.permute.xlu1 %286  ;;  %v291_v39 = vpop.permute.xlu0 %290 }
  0x9c   : > { %v297_v40 = vadd.f32 %v287_v38, %v273_v30  ;;  %v298_v41 = vadd.f32 %v287_v38, %v274_v31  ;;  %v299_v42 = vadd.f32 %v291_v39, %v275_v32  ;;  %v300_v43 = vadd.f32 %v291_v39, %v276_v33 }
  0x9d   : > { %v310_v44 = vpack.c.bf16 %v304_v35, %v302_v37  ;;  %v309_v45 = vpack.c.bf16 %v303_v34, %v301_v36 }
  0x9e   : > { %v305_v46 = vmax.f32 %v297_v40, 0.0  ;;  %v306_v47 = vmax.f32 %v298_v41, 0.0  ;;  %v307_v48 = vmax.f32 %v299_v42, 0.0  ;;  %v308_v49 = vmax.f32 %v300_v43, 0.0 }
  0x9f   : > { %340 = vxpose.xlu0.c.b16.start [1/2] (short) %v310_v44, 128  ;;  %324 = vxpose.xlu1.c.b16.start [1/2] (short) %v309_v45, 128 }
  0xa0   : > { %v311_v50 = vpack.c.bf16 %v307_v48, %v305_v46  ;;  %v312_v51 = vpack.c.bf16 %v308_v49, %v306_v47 }
  0xa3   : > { %341 = vxpose.xlu0.c.b16.end [2/2] (short) %v312_v51, 128  ;;  %325 = vxpose.xlu1.c.b16.end [2/2] (short) %v311_v50, 128 }
 0x105   : > { %v332_v52 = vpop.trf.xlu1  ;;  %v348_v56 = vpop.trf.xlu0 }
 0x106   : > { %2896 = vmatprep.mubr.msk.bf16.mxu0 %vm368_vm0, %v332_v52 }
 0x109   : > { %v333_v53 = vpop.trf.xlu1  ;;  %v349_v59 = vpop.trf.xlu0 }
 0x10a   : > { %2897 = vmatmul.mubr.msk.bf16.vlgmr.msra.gmra.mrb[0].mxu0 %vm368_vm0, %v333_v53 }
 0x10d   : > { %v334_v54 = vpop.trf.xlu1  ;;  %v350_v61 = vpop.trf.xlu0 }
 0x10e   : > { %2900 = vmatprep.mubr.msk.bf16.mxu0 %vm368_vm0, %v334_v54 }
 0x111   : > { %v335_v55 = vpop.trf.xlu1  ;;  %v351_v63 = vpop.trf.xlu0 }
 0x112   : > { %2901 = vmatmul.mubr.msk.bf16.gmra.mrb[4].mxu0 %vm368_vm0, %v335_v55 }
 0x115   : > { %v336_v57 = vpop.trf.xlu1  ;;  %v352_v0 = vpop.trf.xlu0 }
 0x116   : > { %2904 = vmatprep.mubr.msk.bf16.mxu0 %vm368_vm0, %v336_v57 }
 0x119   : > { %v337_v58 = vpop.trf.xlu1  ;;  %v353_v1 = vpop.trf.xlu0 }
 0x11a   : > { %2905 = vmatmul.mubr.msk.bf16.gmra.mrb[8].mxu0 %vm368_vm0, %v337_v58 }
 0x11d   : > { %v338_v60 = vpop.trf.xlu1  ;;  %v354_v2 = vpop.trf.xlu0 }
 0x11e   : > { %2908 = vmatprep.mubr.msk.bf16.mxu0 %vm368_vm0, %v338_v60 }
 0x121   : > { %v339_v62 = vpop.trf.xlu1  ;;  %v355_v3 = vpop.trf.xlu0 }
 0x122   : > { %2909 = vmatmul.mubr.msk.bf16.gmra.mrb[12].mxu0 %vm368_vm0, %v339_v62 }
 0x123   : > { %2912 = vmatprep.mubr.msk.bf16.mxu0 %vm368_vm0, %v348_v56 }
 0x12a   : > { %2913 = vmatmul.mubr.msk.bf16.gmra.mrb[16].mxu0 %vm368_vm0, %v349_v59 }
 0x12b   : > { %2916 = vmatprep.mubr.msk.bf16.mxu0 %vm368_vm0, %v350_v61 }
 0x132   : > { %2917 = vmatmul.mubr.msk.bf16.gmra.mrb[20].mxu0 %vm368_vm0, %v351_v63 }
 0x133   : > { %2920 = vmatprep.mubr.msk.bf16.mxu0 %vm368_vm0, %v352_v0 }
 0x13a   : > { %2921 = vmatmul.mubr.msk.bf16.gmra.mrb[24].mxu0 %vm368_vm0, %v353_v1 }
 0x13b   : > { %2924 = vmatprep.mubr.msk.bf16.mxu0 %vm368_vm0, %v354_v2 }
 0x142   : > { %2925 = vmatmul.mubr.msk.bf16.gmra.mrb[28].mxu0 %vm368_vm0, %v355_v3 }
 0x1dd   : > { %v2898_v11 = vpop.f32.mrb[0].mxu0 }
 0x1de   : > { %v3156_v12 = vadd.f32 %v2898_v11, %v3151_v9  ;;  %v451_v13 = vpop.f32.mrb[1].mxu0 }
 0x1df   : > { %v3159_v14 = vadd.f32 %v3151_v9, %v451_v13  ;;  %v2899_v15 = vpop.f32.mrb[2].mxu0 }
 0x1e0   : > { %4449 = vst [vmem:[#allocation2_spill] sm:$0xff] %v3156_v12  ;;  %v644_v16 = vcombine.high %v3156_v12, %v3156_v12  ;;  %v651_v17 = vrot.slane %v3156_v12, %v3153_v10  ;;  %v3166_v18 = vadd.f32 %v2899_v15, %v3151_v9  ;;  %v454_v19 = vpop.f32.mrb[3].mxu0 }
 0x1e1   : > { %4450 = vst [vmem:[#allocation3_spill] sm:$0xff] %v3159_v14  ;;  %v610_v20 = vcombine.high %v3159_v14, %v3159_v14  ;;  %v617_v21 = vrot.slane %v3159_v14, %v3153_v10  ;;  %v3173_v22 = vadd.f32 %v3151_v9, %v454_v19 }
 0x1e2   : > { %4451 = vst [vmem:[#allocation4_spill] sm:$0xff] %v3166_v18  ;;  %v658_v23 = vrot.slane %v644_v16, %v3153_v10  ;;  %v659_v24 = vcombine.high %v651_v17, %v651_v17  ;;  %v1339_v25 = vsel %vm1282_vm1, %v651_v17, -inf  ;;  %v661_v26 = vcombine.high %v3166_v18, %v3166_v18 }
 0x1e3   : > { %4452 = vst [vmem:[#allocation5_spill] sm:$0xff] %v3173_v22  ;;  %v1340_v27 = vrot.slane %v1339_v25, 4  ;;  %v624_v28 = vrot.slane %v610_v20, %v3153_v10  ;;  %v625_v29 = vcombine.high %v617_v21, %v617_v21  ;;  %v1283_v30 = vsel %vm1282_vm1, %v617_v21, -inf }
 0x1e4   : > { %v660_v31 = vcombine.high %v658_v23, %v658_v23  ;;  %v1346_v32 = vsel %vm1282_vm1, %v659_v24, -inf  ;;  %v1353_v33 = vsel %vm1282_vm1, %v658_v23, -inf  ;;  %v1284_v34 = vrot.slane %v1283_v30, 4 }
 0x1e5   : > { %v1341_v35 = vmax.f32 %v1339_v25, %v1340_v27  ;;  %v1347_v36 = vrot.slane %v1346_v32, 4  ;;  %v1354_v37 = vrot.slane %v1353_v33, 4  ;;  %v626_v38 = vcombine.high %v624_v28, %v624_v28  ;;  %v3183_v39 = vpop.f32.mrb[4].mxu0 }
 0x1e6   : > { %v1360_v40 = vsel %vm1282_vm1, %v660_v31, -inf  ;;  %v1285_v41 = vmax.f32 %v1283_v30, %v1284_v34  ;;  %v1290_v42 = vsel %vm1282_vm1, %v625_v29, -inf  ;;  %v1297_v43 = vsel %vm1282_vm1, %v624_v28, -inf  ;;  %v3188_v44 = vpop.f32.mrb[5].mxu0 }
 0x1e7   : > { %v1342_v45 = vrot.slane %v1341_v35, 2  ;;  %v1348_v46 = vmax.f32 %v1346_v32, %v1347_v36  ;;  %v1355_v47 = vmax.f32 %v1353_v33, %v1354_v37  ;;  %v1361_v48 = vrot.slane %v1360_v40, 4  ;;  %v3190_v49 = vpop.f32.mrb[6].mxu0 }
 0x1e8   : > { %v1286_v50 = vrot.slane %v1285_v41, 2  ;;  %v1291_v51 = vrot.slane %v1290_v42, 4  ;;  %v1298_v52 = vrot.slane %v1297_v43, 4  ;;  %v1304_v53 = vsel %vm1282_vm1, %v626_v38, -inf  ;;  %v3193_v54 = vpop.f32.mrb[7].mxu0 }
 0x1e9   : > { %v1343_v55 = vmax.f32 %v1341_v35, %v1342_v45  ;;  %v1349_v56 = vrot.slane %v1348_v46, 2  ;;  %v1356_v57 = vrot.slane %v1355_v47, 2  ;;  %v1362_v58 = vmax.f32 %v1360_v40, %v1361_v48 }
 0x1ea   : > { %v1287_v59 = vmax.f32 %v1285_v41, %v1286_v50  ;;  %v1292_v60 = vmax.f32 %v1290_v42, %v1291_v51  ;;  %v1299_v61 = vmax.f32 %v1297_v43, %v1298_v52  ;;  %v1305_v62 = vrot.slane %v1304_v53, 4 }
 0x1eb   : > { %v1344_v63 = vrot.slane %v1343_v55, 1  ;;  %v1350_v0 = vmax.f32 %v1348_v46, %v1349_v56  ;;  %v1357_v1 = vmax.f32 %v1355_v47, %v1356_v57  ;;  %v1363_v2 = vrot.slane %v1362_v58, 2 }
 0x1ec   : > { %v1288_v3 = vrot.slane %v1287_v59, 1  ;;  %v1293_v4 = vrot.slane %v1292_v60, 2  ;;  %v1300_v5 = vrot.slane %v1299_v61, 2  ;;  %v1306_v6 = vmax.f32 %v1304_v53, %v1305_v62 }
 0x1ed   : > { %v3195_v7 = vmax.f32 %v1343_v55, %v1344_v63  ;;  %v1351_v8 = vrot.slane %v1350_v0, 1  ;;  %v1358_v11 = vrot.slane %v1357_v1, 1  ;;  %v1364_v13 = vmax.f32 %v1362_v58, %v1363_v2  ;;  %v3197_v15 = vpop.f32.mrb[8].mxu0 }
 0x1ee   : > { %v3199_v16 = vmax.f32 %v1287_v59, %v1288_v3  ;;  %v1294_v17 = vmax.f32 %v1292_v60, %v1293_v4  ;;  %v1301_v19 = vmax.f32 %v1299_v61, %v1300_v5  ;;  %v1307_v20 = vrot.slane %v1306_v6, 2  ;;  %v3201_v21 = vpop.f32.mrb[9].mxu0 }
 0x1ef   : > { %v3203_v23 = vmax.f32 %v1350_v0, %v1351_v8  ;;  %v3205_v24 = vmax.f32 %v1357_v1, %v1358_v11  ;;  %v1365_v25 = vrot.slane %v1364_v13, 1  ;;  %v668_v27 = vrot.slane %v3166_v18, %v3153_v10  ;;  %v3209_v28 = vpop.f32.mrb[10].mxu0 }
 0x1f0   : > { %v1295_v29 = vrot.slane %v1294_v17, 1  ;;  %v1302_v30 = vrot.slane %v1301_v19, 1  ;;  %v1308_v31 = vmax.f32 %v1306_v6, %v1307_v20  ;;  %v3213_v33 = vpop.f32.mrb[11].mxu0  ;;  %v675_v35 = vrot.slane %v661_v26, %v3153_v10 }
 0x1f1   : > { %v3215_v34 = vmax.f32 %v1364_v13, %v1365_v25  ;;  %v676_v36 = vcombine.high %v668_v27, %v668_v27  ;;  %v1367_v37 = vsel %vm1282_vm1, %v668_v27, -inf  ;;  %v627_v56 = vcombine.high %v3173_v22, %v3173_v22 }
 0x1f2   : > { %v3222_v38 = vmax.f32 %v1294_v17, %v1295_v29  ;;  %v3224_v40 = vmax.f32 %v1301_v19, %v1302_v30  ;;  %v1309_v41 = vrot.slane %v1308_v31, 1  ;;  %v1368_v42 = vrot.slane %v1367_v37, 4 }
 0x1f3   : > { %v677_v43 = vcombine.high %v675_v35, %v675_v35  ;;  %v1374_v45 = vsel %vm1282_vm1, %v676_v36, -inf  ;;  %v1381_v46 = vsel %vm1282_vm1, %v675_v35, -inf  ;;  %v634_v60 = vrot.slane %v3173_v22, %v3153_v10 }
 0x1f4   : > { %v3230_v48 = vmax.f32 %v1308_v31, %v1309_v41  ;;  %v1369_v51 = vmax.f32 %v1367_v37, %v1368_v42  ;;  %v1375_v52 = vrot.slane %v1374_v45, 4  ;;  %v1382_v53 = vrot.slane %v1381_v46, 4 }
 0x1f5   : > { %v1388_v55 = vsel %vm1282_vm1, %v677_v43, -inf  ;;  %v3239_v57 = vpop.f32.mrb[12].mxu0  ;;  %v641_v1 = vrot.slane %v627_v56, %v3153_v10  ;;  %v3250_v2 = vadd.f32 %v3183_v39, %v3151_v9  ;;  %v642_v6 = vcombine.high %v634_v60, %v634_v60 }
 0x1f6   : > { %v1370_v58 = vrot.slane %v1369_v51, 2  ;;  %v1389_v59 = vrot.slane %v1388_v55, 4  ;;  %v3245_v62 = vpop.f32.mrb[13].mxu0  ;;  %v1376_v63 = vmax.f32 %v1374_v45, %v1375_v52  ;;  %v1383_v0 = vmax.f32 %v1381_v46, %v1382_v53 }
 0x1f7   : > { %4453 = vst [vmem:[#allocation6_spill] sm:$0xff] %v3250_v2  ;;  %v3252_v3 = vpop.f32.mrb[14].mxu0  ;;  %v1311_v8 = vsel %vm1282_vm1, %v634_v60, -inf  ;;  %v643_v19 = vcombine.high %v641_v1, %v641_v1  ;;  %v1318_v27 = vsel %vm1282_vm1, %v642_v6, -inf  ;;  %v1325_v39 = vsel %vm1282_vm1, %v641_v1, -inf }
 0x1f8   : > { %v1371_v4 = vmax.f32 %v1369_v51, %v1370_v58  ;;  %v3254_v5 = vmax.f32 %v1388_v55, %v1389_v59  ;;  %v3257_v11 = vpop.f32.mrb[15].mxu0  ;;  %v1377_v13 = vrot.slane %v1376_v63, 2  ;;  %v1384_v17 = vrot.slane %v1383_v0, 2 }
 0x1f9   : > { %v1312_v20 = vrot.slane %v1311_v8, 4  ;;  %v712_v29 = vcombine.high %v3250_v2, %v3250_v2  ;;  %v1319_v36 = vrot.slane %v1318_v27, 4  ;;  %v1326_v41 = vrot.slane %v1325_v39, 4 }
 0x1fa   : > { %v1372_v25 = vrot.slane %v1371_v4, 1  ;;  %v3263_v30 = vmax.f32 %v1376_v63, %v1377_v13  ;;  %v3265_v31 = vmax.f32 %v1383_v0, %v1384_v17  ;;  %v1332_v42 = vsel %vm1282_vm1, %v643_v19, -inf }
 0x1fb   : > { %v1313_v35 = vmax.f32 %v1311_v8, %v1312_v20  ;;  %v719_v43 = vrot.slane %v3250_v2, %v3153_v10  ;;  %v1320_v51 = vmax.f32 %v1318_v27, %v1319_v36  ;;  %v1333_v52 = vrot.slane %v1332_v42, 4 }
 0x1fc   : > { %v3267_v37 = vmax.f32 %v1371_v4, %v1372_v25  ;;  %v1327_v55 = vmax.f32 %v1325_v39, %v1326_v41  ;;  %v726_v56 = vrot.slane %v712_v29, %v3153_v10 }
 0x1fd   : > { %v1314_v46 = vrot.slane %v1313_v35, 2  ;;  %v3273_v53 = vpop.f32.mrb[16].mxu0  ;;  %v727_v58 = vcombine.high %v719_v43, %v719_v43  ;;  %v1451_v59 = vsel %vm1282_vm1, %v719_v43, -inf  ;;  %v1321_v0 = vrot.slane %v1320_v51, 2 }
 0x1fe   : > { %v3277_v60 = vpop.f32.mrb[17].mxu0  ;;  %v3279_v1 = vmax.f32 %v1332_v42, %v1333_v52  ;;  %v1452_v4 = vrot.slane %v1451_v59, 4  ;;  %v1328_v8 = vrot.slane %v1327_v55, 2  ;;  %v728_v13 = vcombine.high %v726_v56, %v726_v56 }
 0x1ff   : > { %v1315_v63 = vmax.f32 %v1313_v35, %v1314_v46  ;;  %v3281_v6 = vpop.f32.mrb[18].mxu0  ;;  %v1458_v17 = vsel %vm1282_vm1, %v727_v58, -inf  ;;  %v1465_v19 = vsel %vm1282_vm1, %v726_v56, -inf  ;;  %v3287_v27 = vmax.f32 %v1320_v51, %v1321_v0 }
 0x200   : > { %v3285_v20 = vpop.f32.mrb[19].mxu0  ;;  %v1453_v39 = vmax.f32 %v1451_v59, %v1452_v4  ;;  %v1459_v29 = vrot.slane %v1458_v17, 4  ;;  %v3289_v35 = vmax.f32 %v1327_v55, %v1328_v8  ;;  %v1466_v36 = vrot.slane %v1465_v19, 4 }
 0x201   : > { %v1316_v25 = vrot.slane %v1315_v63, 1  ;;  %v1472_v41 = vsel %vm1282_vm1, %v728_v13, -inf  ;;  %v3294_v42 = vadd.f32 %v3151_v9, %v3188_v44  ;;  %v3305_v44 = vadd.f32 %v3190_v49, %v3151_v9 }
 0x202   : > { %v1454_v52 = vrot.slane %v1453_v39, 2  ;;  %v1460_v56 = vmax.f32 %v1458_v17, %v1459_v29  ;;  %v1467_v58 = vmax.f32 %v1465_v19, %v1466_v36  ;;  %v1473_v51 = vrot.slane %v1472_v41, 4 }
 0x203   : > { %4454 = vst [vmem:[#allocation7_spill] sm:$0xff] %v3294_v42  ;;  %v3296_v43 = vmax.f32 %v1315_v63, %v1316_v25  ;;  %v678_v59 = vcombine.high %v3294_v42, %v3294_v42  ;;  %v685_v55 = vrot.slane %v3294_v42, %v3153_v10  ;;  %4455 = vst [vmem:[#allocation8_spill] sm:$0xff] %v3305_v44 }
 0x204   : > { %v1455_v0 = vmax.f32 %v1453_v39, %v1454_v52  ;;  %v1461_v4 = vrot.slane %v1460_v56, 2  ;;  %v3309_v63 = vadd.f32 %v3151_v9, %v3193_v54  ;;  %v1468_v8 = vrot.slane %v1467_v58, 2 }
 0x205   : > { %v1474_v13 = vmax.f32 %v1472_v41, %v1473_v51  ;;  %v692_v17 = vrot.slane %v678_v59, %v3153_v10  ;;  %v693_v19 = vcombine.high %v685_v55, %v685_v55  ;;  %v1395_v36 = vsel %vm1282_vm1, %v685_v55, -inf }
 0x206   : > { %4456 = vst [vmem:[#allocation9_spill] sm:$0xff] %v3309_v63  ;;  %v1456_v25 = vrot.slane %v1455_v0, 1  ;;  %v1462_v29 = vmax.f32 %v1460_v56, %v1461_v4  ;;  %v729_v39 = vcombine.high %v3305_v44, %v3305_v44  ;;  %v1469_v52 = vmax.f32 %v1467_v58, %v1468_v8 }
 0x207   : > { %v1475_v47 = vrot.slane %v1474_v13, 2  ;;  %v694_v49 = vcombine.high %v692_v17, %v692_v17  ;;  %v1396_v61 = vrot.slane %v1395_v36, 4  ;;  %v1402_v26 = vsel %vm1282_vm1, %v693_v19, -inf }
 0x208   : > { %v3315_v50 = vmax.f32 %v1455_v0, %v1456_v25  ;;  %v1463_v54 = vrot.slane %v1462_v29, 1  ;;  %v1409_v41 = vsel %vm1282_vm1, %v692_v17, -inf  ;;  %v1470_v51 = vrot.slane %v1469_v52, 1 }
 0x209   : > { %v1476_v59 = vmax.f32 %v1474_v13, %v1475_v47  ;;  %v1397_v32 = vmax.f32 %v1395_v36, %v1396_v61  ;;  %v1403_v56 = vrot.slane %v1402_v26, 4  ;;  %v1410_v55 = vrot.slane %v1409_v41, 4 }
 0x20a   : > { %4457 = vst [vmem:[#allocation10_spill] sm:$0xff] %v3315_v50  ;;  %v3319_v4 = vmax.f32 %v1462_v29, %v1463_v54  ;;  %v1416_v45 = vsel %vm1282_vm1, %v694_v49, -inf  ;;  %v736_v58 = vrot.slane %v3305_v44, %v3153_v10  ;;  %v3324_v8 = vmax.f32 %v1469_v52, %v1470_v51 }
 0x20b   : > { %v1477_v0 = vrot.slane %v1476_v59, 1  ;;  %v1398_v25 = vrot.slane %v1397_v32, 2  ;;  %v1404_v46 = vmax.f32 %v1402_v26, %v1403_v56  ;;  %v1411_v19 = vmax.f32 %v1409_v41, %v1410_v55 }
 0x20c   : > { %4458 = vst [vmem:[#allocation11_spill] sm:$0xff] %v3319_v4  ;;  %4459 = vst [vmem:[#allocation12_spill] sm:$0xff] %v3324_v8  ;;  %v1417_v12 = vrot.slane %v1416_v45, 4  ;;  %v743_v17 = vrot.slane %v729_v39, %v3153_v10  ;;  %v744_v47 = vcombine.high %v736_v58, %v736_v58  ;;  %v1479_v36 = vsel %vm1282_vm1, %v736_v58, -inf }
 0x20d   : > { %v3327_v61 = vmax.f32 %v1476_v59, %v1477_v0  ;;  %v1399_v13 = vmax.f32 %v1397_v32, %v1398_v25  ;;  %v1405_v29 = vrot.slane %v1404_v46, 2  ;;  %v1412_v49 = vrot.slane %v1411_v19, 2  ;;  %v3332_v59 = vpop.f32.mrb[20].mxu0 }
 0x20e   : > { %v1418_v54 = vmax.f32 %v1416_v45, %v1417_v12  ;;  %v745_v18 = vcombine.high %v743_v17, %v743_v17  ;;  %v1480_v14 = vrot.slane %v1479_v36, 4  ;;  %v1486_v22 = vsel %vm1282_vm1, %v744_v47, -inf  ;;  %4461 = vst [vmem:[#allocation14_spill] sm:$0xff] %v3332_v59 }
 0x20f   : > { %4460 = vst [vmem:[#allocation13_spill] sm:$0xff] %v3327_v61  ;;  %v1400_v52 = vrot.slane %v1399_v13, 1  ;;  %v1406_v51 = vmax.f32 %v1404_v46, %v1405_v29  ;;  %v1493_v26 = vsel %vm1282_vm1, %v743_v17, -inf  ;;  %v1413_v41 = vmax.f32 %v1411_v19, %v1412_v49 }
 0x210   : > { %v1419_v56 = vrot.slane %v1418_v54, 2  ;;  %v1481_v39 = vmax.f32 %v1479_v36, %v1480_v14  ;;  %v1487_v55 = vrot.slane %v1486_v22, 4  ;;  %v1494_v58 = vrot.slane %v1493_v26, 4 }
 0x211   : > { %v3334_v32 = vmax.f32 %v1399_v13, %v1400_v52  ;;  %v1407_v0 = vrot.slane %v1406_v51, 1  ;;  %v1500_v12 = vsel %vm1282_vm1, %v745_v18, -inf  ;;  %v1414_v45 = vrot.slane %v1413_v41, 1 }
 0x212   : > { %v1420_v25 = vmax.f32 %v1418_v54, %v1419_v56  ;;  %v1482_v61 = vrot.slane %v1481_v39, 2  ;;  %v1488_v46 = vmax.f32 %v1486_v22, %v1487_v55  ;;  %v1495_v17 = vmax.f32 %v1493_v26, %v1494_v58  ;;  %v3355_v56 = vpop.f32.mrb[21].mxu0 }
 0x213   : > { %4462 = vst [vmem:[#allocation15_spill] sm:$0xff] %v3334_v32  ;;  %v3337_v29 = vmax.f32 %v1406_v51, %v1407_v0  ;;  %v1501_v14 = vrot.slane %v1500_v12, 4  ;;  %v3341_v47 = vmax.f32 %v1413_v41, %v1414_v45  ;;  %4467 = vst [vmem:[#allocation20_spill] sm:$0xff] %v3355_v56  ;;  %v702_v55 = vrot.slane %v3309_v63, %v3153_v10  ;;  %v3365_v58 = vpop.f32.mrb[22].mxu0 }
 0x214   : > { %v1421_v36 = vrot.slane %v1420_v25, 1  ;;  %v1483_v13 = vmax.f32 %v1481_v39, %v1482_v61  ;;  %v1489_v49 = vrot.slane %v1488_v46, 2  ;;  %v1496_v18 = vrot.slane %v1495_v17, 2  ;;  %4469 = vst [vmem:[#allocation22_spill] sm:$0xff] %v3365_v58  ;;  %v3395_v19 = vpop.f32.mrb[23].mxu0 }
 0x215   : > { %4463 = vst [vmem:[#allocation16_spill] sm:$0xff] %v3337_v29  ;;  %4464 = vst [vmem:[#allocation17_spill] sm:$0xff] %v3341_v47  ;;  %v3345_v59 = vmax.f32 %v1500_v12, %v1501_v14  ;;  %v695_v39 = vcombine.high %v3309_v63, %v3309_v63  ;;  %v710_v14 = vcombine.high %v702_v55, %v702_v55 }
 0x216   : > { %v3349_v54 = vmax.f32 %v1420_v25, %v1421_v36  ;;  %v1484_v26 = vrot.slane %v1483_v13, 1  ;;  %v3353_v41 = vmax.f32 %v1488_v46, %v1489_v49  ;;  %v3357_v61 = vmax.f32 %v1495_v17, %v1496_v18  ;;  %4474 = vst [vmem:[#allocation27_spill] sm:$0xff] %v3395_v19 }
 0x217   : > { %4465 = vst [vmem:[#allocation18_spill] sm:$0xff] %v3345_v59  ;;  %v3372_v25 = vadd.f32 %v3197_v15, %v3151_v9  ;;  %v3376_v46 = vadd.f32 %v3151_v9, %v3201_v21  ;;  %v709_v17 = vrot.slane %v695_v39, %v3153_v10  ;;  %v1423_v36 = vsel %vm1282_vm1, %v702_v55, -inf }
 0x218   : > { %4466 = vst [vmem:[#allocation19_spill] sm:$0xff] %v3349_v54  ;;  %4468 = vst [vmem:[#allocation21_spill] sm:$0xff] %v3357_v61  ;;  %v3367_v12 = vmax.f32 %v1483_v13, %v1484_v26  ;;  %v3382_v49 = vadd.f32 %v3209_v28, %v3151_v9  ;;  %v1424_v13 = vrot.slane %v1423_v36, 4  ;;  %v1430_v39 = vsel %vm1282_vm1, %v710_v14, -inf }
 0x219   : > { %4471 = vst [vmem:[#allocation24_spill] sm:$0xff] %v3372_v25  ;;  %4472 = vst [vmem:[#allocation25_spill] sm:$0xff] %v3376_v46  ;;  %v780_v18 = vcombine.high %v3372_v25, %v3372_v25  ;;  %v787_v15 = vrot.slane %v3372_v25, %v3153_v10  ;;  %v746_v21 = vcombine.high %v3376_v46, %v3376_v46  ;;  %v1437_v22 = vsel %vm1282_vm1, %v709_v17, -inf }
 0x21a   : > { %4470 = vst [vmem:[#allocation23_spill] sm:$0xff] %v3367_v12  ;;  %4473 = vst [vmem:[#allocation26_spill] sm:$0xff] %v3382_v49  ;;  %v711_v26 = vcombine.high %v709_v17, %v709_v17  ;;  %v753_v55 = vrot.slane %v3376_v46, %v3153_v10  ;;  %v1425_v28 = vmax.f32 %v1423_v36, %v1424_v13  ;;  %v1431_v0 = vrot.slane %v1430_v39, 4 }
 0x21b   : > { %v1438_v51 = vrot.slane %v1437_v22, 4  ;;  %v794_v52 = vrot.slane %v780_v18, %v3153_v10  ;;  %v795_v2 = vcombine.high %v787_v15, %v787_v15  ;;  %v1563_v44 = vsel %vm1282_vm1, %v787_v15, -inf }
 0x21c   : > { %v1444_v45 = vsel %vm1282_vm1, %v711_v26, -inf  ;;  %v760_v42 = vrot.slane %v746_v21, %v3153_v10  ;;  %v1426_v14 = vrot.slane %v1425_v28, 2  ;;  %v1432_v63 = vmax.f32 %v1430_v39, %v1431_v0 }
 0x21d   : > { %v1439_v17 = vmax.f32 %v1437_v22, %v1438_v51  ;;  %v1445_v58 = vrot.slane %v1444_v45, 4  ;;  %v796_v56 = vcombine.high %v794_v52, %v794_v52  ;;  %v1564_v8 = vrot.slane %v1563_v44, 4 }
 0x21e   : > { %v1570_v36 = vsel %vm1282_vm1, %v795_v2, -inf  ;;  %v1577_v13 = vsel %vm1282_vm1, %v794_v52, -inf  ;;  %v1427_v18 = vmax.f32 %v1425_v28, %v1426_v14  ;;  %v1433_v47 = vrot.slane %v1432_v63, 2 }
 0x21f   : > { %v1440_v19 = vrot.slane %v1439_v17, 2  ;;  %v3402_v4 = vmax.f32 %v1444_v45, %v1445_v58  ;;  %v1565_v26 = vmax.f32 %v1563_v44, %v1564_v8  ;;  %v1571_v29 = vrot.slane %v1570_v36, 4 }
 0x220   : > { %v1578_v15 = vrot.slane %v1577_v13, 4  ;;  %v1584_v21 = vsel %vm1282_vm1, %v796_v56, -inf  ;;  %v1428_v50 = vrot.slane %v1427_v18, 1  ;;  %v3405_v0 = vmax.f32 %v1432_v63, %v1433_v47 }
 0x221   : > { %v3407_v22 = vmax.f32 %v1439_v17, %v1440_v19  ;;  %v1585_v51 = vrot.slane %v1584_v21, 4  ;;  %v1566_v39 = vrot.slane %v1565_v26, 2  ;;  %v1572_v2 = vmax.f32 %v1570_v36, %v1571_v29 }
 0x222   : > { %v1579_v32 = vmax.f32 %v1577_v13, %v1578_v15  ;;  %v761_v52 = vcombine.high %v753_v55, %v753_v55  ;;  %v3409_v28 = vmax.f32 %v1427_v18, %v1428_v50  ;;  %v762_v44 = vcombine.high %v760_v42, %v760_v42 }
 0x223   : > { %v1586_v45 = vmax.f32 %v1584_v21, %v1585_v51  ;;  %v1567_v8 = vmax.f32 %v1565_v26, %v1566_v39  ;;  %v1573_v14 = vrot.slane %v1572_v2, 2  ;;  %v1507_v56 = vsel %vm1282_vm1, %v753_v55, -inf }
 0x224   : > { %4475 = vst [vmem:[#allocation28_spill] sm:$0xff] %v3409_v28  ;;  %v1580_v12 = vrot.slane %v1579_v32, 2  ;;  %v1508_v47 = vrot.slane %v1507_v56, 4  ;;  %v1514_v19 = vsel %vm1282_vm1, %v761_v52, -inf  ;;  %v1521_v17 = vsel %vm1282_vm1, %v760_v42, -inf }
 0x225   : > { %v1587_v63 = vrot.slane %v1586_v45, 2  ;;  %v1568_v29 = vrot.slane %v1567_v8, 1  ;;  %v1574_v36 = vmax.f32 %v1572_v2, %v1573_v14  ;;  %v1515_v50 = vrot.slane %v1514_v19, 4 }
 0x226   : > { %v1581_v13 = vmax.f32 %v1579_v32, %v1580_v12  ;;  %v1509_v15 = vmax.f32 %v1507_v56, %v1508_v47  ;;  %v1522_v58 = vrot.slane %v1521_v17, 4  ;;  %v1528_v21 = vsel %vm1282_vm1, %v762_v44, -inf }
 0x227   : > { %v1588_v18 = vmax.f32 %v1586_v45, %v1587_v63  ;;  %v3416_v26 = vmax.f32 %v1567_v8, %v1568_v29  ;;  %v1575_v51 = vrot.slane %v1574_v36, 1  ;;  %v1516_v55 = vmax.f32 %v1514_v19, %v1515_v50 }
 0x228   : > { %v1582_v39 = vrot.slane %v1581_v13, 1  ;;  %v1510_v54 = vrot.slane %v1509_v15, 2  ;;  %v1523_v59 = vmax.f32 %v1521_v17, %v1522_v58  ;;  %v1529_v52 = vrot.slane %v1528_v21, 4 }
 0x229   : > { %4476 = vst [vmem:[#allocation29_spill] sm:$0xff] %v3416_v26  ;;  %v1589_v28 = vrot.slane %v1588_v18, 1  ;;  %v3418_v61 = vmax.f32 %v1574_v36, %v1575_v51  ;;  %v1517_v32 = vrot.slane %v1516_v55, 2  ;;  %v797_v12 = vcombine.high %v3382_v49, %v3382_v49 }
 0x22a   : > { %v3420_v42 = vmax.f32 %v1581_v13, %v1582_v39  ;;  %v1511_v45 = vmax.f32 %v1509_v15, %v1510_v54  ;;  %v1524_v44 = vrot.slane %v1523_v59, 2  ;;  %v1530_v8 = vmax.f32 %v1528_v21, %v1529_v52 }
 0x22b   : > { %4477 = vst [vmem:[#allocation30_spill] sm:$0xff] %v3418_v61  ;;  %v3424_v2 = vmax.f32 %v1588_v18, %v1589_v28  ;;  %v1518_v14 = vmax.f32 %v1516_v55, %v1517_v32  ;;  %v804_v56 = vrot.slane %v3382_v49, %v3153_v10  ;;  %v811_v58 = vrot.slane %v797_v12, %v3153_v10 }
 0x22c   : > { %4478 = vst [vmem:[#allocation31_spill] sm:$0xff] %v3420_v42  ;;  %v1512_v47 = vrot.slane %v1511_v45, 1  ;;  %v1525_v19 = vmax.f32 %v1523_v59, %v1524_v44  ;;  %v1531_v17 = vrot.slane %v1530_v8, 2  ;;  %v3433_v29 = vadd.f32 %v3151_v9, %v3213_v33 }
 0x22d   : > { %4479 = vst [vmem:[#allocation32_spill] sm:$0xff] %v3424_v2  ;;  %v1519_v28 = vrot.slane %v1518_v14, 1  ;;  %v812_v54 = vcombine.high %v804_v56, %v804_v56  ;;  %v813_v36 = vcombine.high %v811_v58, %v811_v58  ;;  %v1591_v13 = vsel %vm1282_vm1, %v804_v56, -inf }
 0x22e   : > { %4480 = vst [vmem:[#allocation33_spill] sm:$0xff] %v3433_v29  ;;  %v3436_v50 = vmax.f32 %v1511_v45, %v1512_v47  ;;  %v1526_v18 = vrot.slane %v1525_v19, 1  ;;  %v1532_v15 = vmax.f32 %v1530_v8, %v1531_v17  ;;  %v1592_v21 = vrot.slane %v1591_v13, 4 }
 0x22f   : > { %v3438_v51 = vmax.f32 %v1518_v14, %v1519_v28  ;;  %v1598_v39 = vsel %vm1282_vm1, %v812_v54, -inf  ;;  %v1605_v59 = vsel %vm1282_vm1, %v811_v58, -inf  ;;  %v1612_v55 = vsel %vm1282_vm1, %v813_v36, -inf }
 0x230   : > { %4481 = vst [vmem:[#allocation34_spill] sm:$0xff] %v3436_v50  ;;  %v3443_v33 = vmax.f32 %v1525_v19, %v1526_v18  ;;  %v1533_v52 = vrot.slane %v1532_v15, 1  ;;  %v1593_v12 = vmax.f32 %v1591_v13, %v1592_v21  ;;  %v1599_v44 = vrot.slane %v1598_v39, 4 }
 0x231   : > { %4482 = vst [vmem:[#allocation35_spill] sm:$0xff] %v3438_v51  ;;  %v1606_v8 = vrot.slane %v1605_v59, 4  ;;  %v1613_v14 = vrot.slane %v1612_v55, 4  ;;  %v763_v19 = vcombine.high %v3433_v29, %v3433_v29  ;;  %v770_v36 = vrot.slane %v3433_v29, %v3153_v10 }
 0x232   : > { %4483 = vst [vmem:[#allocation36_spill] sm:$0xff] %v3443_v33  ;;  %v3449_v56 = vmax.f32 %v1532_v15, %v1533_v52  ;;  %v1594_v47 = vrot.slane %v1593_v12, 2  ;;  %v1600_v17 = vmax.f32 %v1598_v39, %v1599_v44  ;;  %v3464_v21 = vadd.f32 %v3239_v57, %v3151_v9 }
 0x233   : > { %v1607_v28 = vmax.f32 %v1605_v59, %v1606_v8  ;;  %v3455_v54 = vmax.f32 %v1612_v55, %v1613_v14  ;;  %v777_v18 = vrot.slane %v763_v19, %v3153_v10  ;;  %v778_v58 = vcombine.high %v770_v36, %v770_v36 }
 0x234   : > { %4484 = vst [vmem:[#allocation37_spill] sm:$0xff] %v3449_v56  ;;  %v1595_v13 = vmax.f32 %v1593_v12, %v1594_v47  ;;  %4486 = vst [vmem:[#allocation39_spill] sm:$0xff] %v3464_v21  ;;  %v1601_v52 = vrot.slane %v1600_v17, 2  ;;  %v1535_v39 = vsel %vm1282_vm1, %v770_v36, -inf  ;;  %v3468_v12 = vpop.f32.mrb[24].mxu0 }
 0x235   : > { %4485 = vst [vmem:[#allocation38_spill] sm:$0xff] %v3455_v54  ;;  %v1608_v63 = vrot.slane %v1607_v28, 2  ;;  %v779_v55 = vcombine.high %v777_v18, %v777_v18  ;;  %v1536_v44 = vrot.slane %v1535_v39, 4  ;;  %v1549_v8 = vsel %vm1282_vm1, %v777_v18, -inf  ;;  %4487 = vst [vmem:[#allocation40_spill] sm:$0xff] %v3468_v12 }
 0x236   : > { %v1596_v59 = vrot.slane %v1595_v13, 1  ;;  %v3470_v14 = vmax.f32 %v1600_v17, %v1601_v52  ;;  %v1542_v19 = vsel %vm1282_vm1, %v778_v58, -inf  ;;  %v1550_v57 = vrot.slane %v1549_v8, 4 }
 0x237   : > { %v3472_v47 = vmax.f32 %v1607_v28, %v1608_v63  ;;  %v1537_v45 = vmax.f32 %v1535_v39, %v1536_v44  ;;  %v1543_v32 = vrot.slane %v1542_v19, 4  ;;  %v1556_v36 = vsel %vm1282_vm1, %v779_v55, -inf }
 0x238   : > { %4488 = vst [vmem:[#allocation41_spill] sm:$0xff] %v3470_v14  ;;  %v3475_v15 = vmax.f32 %v1595_v13, %v1596_v59  ;;  %v1551_v49 = vmax.f32 %v1549_v8, %v1550_v57  ;;  %v1557_v46 = vrot.slane %v1556_v36, 4  ;;  %v848_v18 = vcombine.high %v3464_v21, %v3464_v21 }
 0x239   : > { %4489 = vst [vmem:[#allocation42_spill] sm:$0xff] %v3472_v47  ;;  %v1538_v17 = vrot.slane %v1537_v45, 2  ;;  %v1544_v52 = vmax.f32 %v1542_v19, %v1543_v32  ;;  %v855_v63 = vrot.slane %v3464_v21, %v3153_v10  ;;  %v3485_v58 = vadd.f32 %v3151_v9, %v3245_v62  ;;  %v3495_v19 = vpop.f32.mrb[25].mxu0 }
 0x23a   : > { %4490 = vst [vmem:[#allocation43_spill] sm:$0xff] %v3475_v15  ;;  %v1552_v28 = vrot.slane %v1551_v49, 2  ;;  %v3487_v13 = vmax.f32 %v1556_v36, %v1557_v46  ;;  %v862_v39 = vrot.slane %v848_v18, %v3153_v10  ;;  %v3492_v59 = vadd.f32 %v3252_v3, %v3151_v9  ;;  %4493 = vst [vmem:[#allocation46_spill] sm:$0xff] %v3495_v19  ;;  %v3500_v36 = vpop.f32.mrb[26].mxu0 }
 0x23b   : > { %4491 = vst [vmem:[#allocation44_spill] sm:$0xff] %v3485_v58  ;;  %v1539_v55 = vmax.f32 %v1537_v45, %v1538_v17  ;;  %v1545_v44 = vrot.slane %v1544_v52, 2  ;;  %v863_v8 = vcombine.high %v855_v63, %v855_v63  ;;  %v1675_v32 = vsel %vm1282_vm1, %v855_v63, -inf  ;;  %4494 = vst [vmem:[#allocation47_spill] sm:$0xff] %v3500_v36  ;;  %v3520_v51 = vpop.f32.mrb[27].mxu0 }
 0x23c   : > { %4492 = vst [vmem:[#allocation45_spill] sm:$0xff] %v3492_v59  ;;  %v3497_v57 = vmax.f32 %v1551_v49, %v1552_v28  ;;  %v864_v62 = vcombine.high %v862_v39, %v862_v39  ;;  %v1676_v25 = vrot.slane %v1675_v32, 4  ;;  %v1689_v46 = vsel %vm1282_vm1, %v862_v39, -inf  ;;  %4496 = vst [vmem:[#allocation49_spill] sm:$0xff] %v3520_v51 }
 0x23d   : > { %v1540_v18 = vrot.slane %v1539_v55, 1  ;;  %v3502_v29 = vmax.f32 %v1544_v52, %v1545_v44  ;;  %v1682_v3 = vsel %vm1282_vm1, %v863_v8, -inf  ;;  %v1690_v45 = vrot.slane %v1689_v46, 4 }
 0x23e   : > { %v1677_v17 = vmax.f32 %v1675_v32, %v1676_v25  ;;  %v1683_v12 = vrot.slane %v1682_v3, 4  ;;  %v1696_v63 = vsel %vm1282_vm1, %v864_v62, -inf  ;;  %v814_v49 = vcombine.high %v3485_v58, %v3485_v58 }
 0x23f   : > { %v3508_v28 = vmax.f32 %v1539_v55, %v1540_v18  ;;  %v1691_v39 = vmax.f32 %v1689_v46, %v1690_v45  ;;  %v1697_v42 = vrot.slane %v1696_v63, 4  ;;  %v821_v52 = vrot.slane %v3485_v58, %v3153_v10 }
 0x240   : > { %v1678_v36 = vrot.slane %v1677_v17, 2  ;;  %v1684_v33 = vmax.f32 %v1682_v3, %v1683_v12  ;;  %v828_v44 = vrot.slane %v814_v49, %v3153_v10  ;;  %v865_v32 = vcombine.high %v3492_v59, %v3492_v59 }
 0x241   : > { %4495 = vst [vmem:[#allocation48_spill] sm:$0xff] %v3508_v28  ;;  %v1692_v25 = vrot.slane %v1691_v39, 2  ;;  %v1698_v8 = vmax.f32 %v1696_v63, %v1697_v42  ;;  %v872_v55 = vrot.slane %v3492_v59, %v3153_v10  ;;  %v829_v19 = vcombine.high %v821_v52, %v821_v52 }
 0x242   : > { %v1679_v62 = vmax.f32 %v1677_v17, %v1678_v36  ;;  %v1685_v18 = vrot.slane %v1684_v33, 2  ;;  %v830_v46 = vcombine.high %v828_v44, %v828_v44  ;;  %v1619_v12 = vsel %vm1282_vm1, %v821_v52, -inf }
 0x243   : > { %v1693_v45 = vmax.f32 %v1691_v39, %v1692_v25  ;;  %v1699_v61 = vrot.slane %v1698_v8, 2  ;;  %v1633_v3 = vsel %vm1282_vm1, %v828_v44, -inf  ;;  %v1620_v63 = vrot.slane %v1619_v12, 4 }
 0x244   : > { %v1680_v49 = vrot.slane %v1679_v62, 1  ;;  %v1686_v42 = vmax.f32 %v1684_v33, %v1685_v18  ;;  %v1626_v26 = vsel %vm1282_vm1, %v829_v19, -inf  ;;  %v1634_v36 = vrot.slane %v1633_v3, 4 }
 0x245   : > { %v1694_v50 = vrot.slane %v1693_v45, 1  ;;  %v1700_v28 = vmax.f32 %v1698_v8, %v1699_v61  ;;  %v1627_v15 = vrot.slane %v1626_v26, 4  ;;  %v1621_v39 = vmax.f32 %v1619_v12, %v1620_v63 }
 0x246   : > { %v3523_v17 = vmax.f32 %v1679_v62, %v1680_v49  ;;  %v1687_v56 = vrot.slane %v1686_v42, 1  ;;  %v1640_v25 = vsel %vm1282_vm1, %v830_v46, -inf  ;;  %v1635_v51 = vmax.f32 %v1633_v3, %v1634_v36 }
 0x247   : > { %v3526_v52 = vmax.f32 %v1693_v45, %v1694_v50  ;;  %v1701_v44 = vrot.slane %v1700_v28, 1  ;;  %v1628_v2 = vmax.f32 %v1626_v26, %v1627_v15  ;;  %v1622_v33 = vrot.slane %v1621_v39, 2 }
 0x248   : > { %v3528_v54 = vmax.f32 %v1686_v42, %v1687_v56  ;;  %v1641_v18 = vrot.slane %v1640_v25, 4  ;;  %v879_v19 = vrot.slane %v865_v32, %v3153_v10  ;;  %v1636_v62 = vrot.slane %v1635_v51, 2 }
 0x249   : > { %v3531_v61 = vmax.f32 %v1700_v28, %v1701_v44  ;;  %v1629_v8 = vrot.slane %v1628_v2, 2  ;;  %v880_v49 = vcombine.high %v872_v55, %v872_v55  ;;  %v1623_v47 = vmax.f32 %v1621_v39, %v1622_v33 }
 0x24a   : > { %v1642_v12 = vmax.f32 %v1640_v25, %v1641_v18  ;;  %v881_v63 = vcombine.high %v879_v19, %v879_v19  ;;  %v1703_v50 = vsel %vm1282_vm1, %v872_v55, -inf  ;;  %v1637_v45 = vmax.f32 %v1635_v51, %v1636_v62 }
 0x24b   : > { %4497 = vst [vmem:[#allocation50_spill] sm:$0xff] %v3531_v61  ;;  %v1630_v46 = vmax.f32 %v1628_v2, %v1629_v8  ;;  %v1704_v26 = vrot.slane %v1703_v50, 4  ;;  %v1710_v56 = vsel %vm1282_vm1, %v880_v49, -inf  ;;  %v1624_v15 = vrot.slane %v1623_v47, 1 }
 0x24c   : > { %v1643_v3 = vrot.slane %v1642_v12, 2  ;;  %v1711_v42 = vrot.slane %v1710_v56, 4  ;;  %v1717_v32 = vsel %vm1282_vm1, %v879_v19, -inf  ;;  %v1638_v36 = vrot.slane %v1637_v45, 1 }
 0x24d   : > { %v1631_v28 = vrot.slane %v1630_v46, 1  ;;  %v1705_v44 = vmax.f32 %v1703_v50, %v1704_v26  ;;  %v1718_v61 = vrot.slane %v1717_v32, 4  ;;  %v3536_v14 = vmax.f32 %v1623_v47, %v1624_v15  ;;  %v3596_v47 = vpop.f32.mrb[28].mxu0 }
 0x24e   : > { %v1644_v39 = vmax.f32 %v1642_v12, %v1643_v3  ;;  %v1712_v25 = vmax.f32 %v1710_v56, %v1711_v42  ;;  %v1724_v55 = vsel %vm1282_vm1, %v881_v63, -inf  ;;  %v3541_v51 = vmax.f32 %v1637_v45, %v1638_v36 }
 0x24f   : > { %v3539_v2 = vmax.f32 %v1630_v46, %v1631_v28  ;;  %v1706_v33 = vrot.slane %v1705_v44, 2  ;;  %v1719_v18 = vmax.f32 %v1717_v32, %v1718_v61  ;;  %v1725_v49 = vrot.slane %v1724_v55, 4 }
 0x250   : > { %v1645_v8 = vrot.slane %v1644_v39, 1  ;;  %v1713_v62 = vrot.slane %v1712_v25, 2  ;;  %v3561_v3 = vadd.f32 %v3151_v9, %v3257_v11  ;;  %v4499_v42 = vrot.slane %v3287_v27, 1 }
 0x251   : > { %v1707_v50 = vmax.f32 %v1705_v44, %v1706_v33  ;;  %v1720_v63 = vrot.slane %v1719_v18, 2  ;;  %v3553_v26 = vmax.f32 %v1724_v55, %v1725_v49  ;;  %v1330_v36 = vrot.slane %v3289_v35, 1 }
 0x252   : > { %v3549_v46 = vmax.f32 %v1644_v39, %v1645_v8  ;;  %v3551_v45 = vmax.f32 %v1712_v25, %v1713_v62  ;;  %4498 = vst [vmem:[#allocation51_spill] sm:$0xff] %v3561_v3  ;;  %v3566_v32 = vmax.f32 %v3287_v27, %v4499_v42  ;;  %v1335_v44 = vrot.slane %v3279_v1, 2 }
 0x253   : > { %v1708_v56 = vrot.slane %v1707_v50, 1  ;;  %v3557_v15 = vmax.f32 %v1719_v18, %v1720_v63  ;;  %v4500_v39 = vrot.slane %v3263_v30, 1  ;;  %v831_v9 = vcombine.high %v3561_v3, %v3561_v3 }
 0x254   : > { %v838_v11 = vrot.slane %v3561_v3, %v3153_v10  ;;  %v1331_v33 = vmax.f32 %v3289_v35, %v1330_v36  ;;  %v1336_v18 = vmax.f32 %v3279_v1, %v1335_v44  ;;  %v1386_v8 = vrot.slane %v3265_v31, 1 }
 0x255   : > { %v1380_v25 = vmax.f32 %v3263_v30, %v4500_v39  ;;  %v3574_v55 = vmax.f32 %v1707_v50, %v1708_v56  ;;  %v1391_v62 = vrot.slane %v3254_v5, 2  ;;  %v845_v30 = vrot.slane %v831_v9, %v3153_v10 }
 0x256   : > { %v846_v49 = vcombine.high %v838_v11, %v838_v11  ;;  %v1647_v50 = vsel %vm1282_vm1, %v838_v11, -inf  ;;  %v2182_v63 = vmax.f32 %v3230_v48, %v3215_v34  ;;  %v1337_v42 = vrot.slane %v1336_v18, 1 }
 0x257   : > { %v1648_v56 = vrot.slane %v1647_v50, 4  ;;  %v1387_v39 = vmax.f32 %v3265_v31, %v1386_v8  ;;  %v1392_v35 = vmax.f32 %v3254_v5, %v1391_v62  ;;  %v847_v36 = vcombine.high %v845_v30, %v845_v30 }
 0x258   : > { %v1654_v1 = vsel %vm1282_vm1, %v846_v49, -inf  ;;  %v1661_v44 = vsel %vm1282_vm1, %v845_v30, -inf  ;;  %v2183_v9 = vmax.f32 %v3296_v43, %v3267_v37  ;;  %v1338_v12 = vmax.f32 %v1336_v18, %v1337_v42 }
 0x259   : > { %v1649_v61 = vmax.f32 %v1647_v50, %v1648_v56  ;;  %v1655_v27 = vrot.slane %v1654_v1, 4  ;;  %v1662_v11 = vrot.slane %v1661_v44, 4  ;;  %v1668_v34 = vsel %vm1282_vm1, %v847_v36, -inf }
 0x25a   : > { %v1393_v48 = vrot.slane %v1392_v35, 1  ;;  %v2184_v31 = vmax.f32 %v3566_v32, %v1380_v25  ;;  %v2185_v5 = vmax.f32 %v1331_v33, %v1387_v39  ;;  %v1669_v19 = vrot.slane %v1668_v34, 4 }
 0x25b   : > { %v1650_v8 = vrot.slane %v1649_v61, 2  ;;  %v1656_v62 = vmax.f32 %v1654_v1, %v1655_v27  ;;  %v1663_v49 = vmax.f32 %v1661_v44, %v1662_v11  ;;  %v4501_v37 = vmax.f32 %v3199_v16, %v3195_v7 }
 0x25c   : > { %v1394_v30 = vmax.f32 %v1392_v35, %v1393_v48  ;;  %v4502_v43 = vmax.f32 %v3222_v38, %v3203_v23  ;;  %v3607_v32 = vmax.f32 %v1668_v34, %v1669_v19  ;;  %v4503_v27 = vmax.f32 %v3224_v40, %v3205_v24  ;;  %v3624_v24 = vld [vmem:[%s4392_s3] ss:$0 sm:$0xff] }
 0x25d   : > { %v1651_v50 = vmax.f32 %v1649_v61, %v1650_v8  ;;  %v1657_v56 = vrot.slane %v1656_v62, 2  ;;  %v1664_v42 = vrot.slane %v1663_v49, 2  ;;  %v3618_v61 = vpop.f32.mrb[29].mxu0  ;;  %v3628_v40 = vadd.f32 %v3624_v24, %v3273_v53 }
 0x25e   : > { %v2308_v18 = vsel %vm2307_vm2, %v4502_v43, %v4501_v37  ;;  %v2186_v25 = vmax.f32 %v1338_v12, %v1394_v30  ;;  %v3630_v12 = vpop.f32.mrb[30].mxu0  ;;  %v3638_v36 = vadd.f32 %v3624_v24, %v3277_v60  ;;  %v3658_v48 = vadd.f32 %v3624_v24, %v3285_v20 }
 0x25f   : > { %v2310_v33 = vsel %vm2309_vm3, %v4503_v27, %v2308_v18  ;;  %v1652_v7 = vrot.slane %v1651_v50, 1  ;;  %v3613_v16 = vmax.f32 %v1656_v62, %v1657_v56  ;;  %v3615_v23 = vmax.f32 %v1663_v49, %v1664_v42  ;;  %4504 = vst [vmem:[#allocation52_spill] sm:$0xff] %v3630_v12 }
 0x260   : > { %v2312_v38 = vsel %vm2311_vm4, %v2182_v63, %v2310_v33  ;;  %v916_v44 = vcombine.high %v3628_v40, %v3628_v40  ;;  %v923_v53 = vrot.slane %v3628_v40, %v3153_v10  ;;  %v882_v34 = vcombine.high %v3638_v36, %v3638_v36 }
 0x261   : > { %v2314_v19 = vsel %vm2313_vm5, %v2183_v9, %v2312_v38  ;;  %v3632_v39 = vmax.f32 %v1651_v50, %v1652_v7  ;;  %v3647_v9 = vadd.f32 %v3624_v24, %v3281_v6  ;;  %v889_v60 = vrot.slane %v3638_v36, %v3153_v10 }
 0x262   : > { %v2316_v35 = vsel %vm2315_vm6, %v2184_v31, %v2314_v19  ;;  %v930_v6 = vrot.slane %v916_v44, %v3153_v10  ;;  %v931_v31 = vcombine.high %v923_v53, %v923_v53  ;;  %v896_v49 = vrot.slane %v882_v34, %v3153_v10  ;;  %v3673_v34 = vpop.f32.mrb[31].mxu0 }
 0x263   : > { %v2318_v1 = vsel %vm2317_vm7, %v2185_v5, %v2316_v35  ;;  %v1787_v5 = vsel %vm1282_vm1, %v923_v53, -inf  ;;  %v933_v8 = vcombine.high %v3647_v9, %v3647_v9  ;;  %v897_v30 = vcombine.high %v889_v60, %v889_v60  ;;  %4506 = vst [vmem:[#allocation54_spill] sm:$0xff] %v3673_v34 }
 0x264   : > { %v3650_v11 = vsel %vm2319_vm8, %v2186_v25, %v2318_v1  ;;  %v1788_v62 = vrot.slane %v1787_v5, 4  ;;  %v1731_v37 = vsel %vm1282_vm1, %v889_v60, -inf  ;;  %v932_v20 = vcombine.high %v930_v6, %v930_v6 }
 0x265   : > { %4505 = vst [vmem:[#allocation53_spill] sm:$0xff] %v3650_v11  ;;  %2370 = vrot.lane.b32.xlu0 %v3650_v11, %s3061_s15  ;;  %v1794_v43 = vsel %vm1282_vm1, %v931_v31, -inf  ;;  %v1801_v18 = vsel %vm1282_vm1, %v930_v6, -inf  ;;  %v1732_v50 = vrot.slane %v1731_v37, 4  ;;  %v898_v27 = vcombine.high %v896_v49, %v896_v49 }
 0x266   : > { %v1789_v56 = vmax.f32 %v1787_v5, %v1788_v62  ;;  %v1795_v42 = vrot.slane %v1794_v43, 4  ;;  %v1802_v25 = vrot.slane %v1801_v18, 4  ;;  %v1808_v33 = vsel %vm1282_vm1, %v932_v20, -inf }
 0x267   : > { %v1733_v7 = vmax.f32 %v1731_v37, %v1732_v50  ;;  %v1738_v38 = vsel %vm1282_vm1, %v897_v30, -inf  ;;  %v1745_v19 = vsel %vm1282_vm1, %v896_v49, -inf  ;;  %v1809_v53 = vrot.slane %v1808_v33, 4 }
 0x268   : > { %v1790_v35 = vrot.slane %v1789_v56, 2  ;;  %v1796_v1 = vmax.f32 %v1794_v43, %v1795_v42  ;;  %v1803_v44 = vmax.f32 %v1801_v18, %v1802_v25  ;;  %v1739_v6 = vrot.slane %v1738_v38, 4 }
 0x269   : > { %v1734_v60 = vrot.slane %v1733_v7, 2  ;;  %v1746_v31 = vrot.slane %v1745_v19, 4  ;;  %v1752_v5 = vsel %vm1282_vm1, %v898_v27, -inf  ;;  %v1810_v20 = vmax.f32 %v1808_v33, %v1809_v53 }
 0x26a   : > { %v1791_v62 = vmax.f32 %v1789_v56, %v1790_v35  ;;  %v1797_v28 = vrot.slane %v1796_v1, 2  ;;  %v1804_v63 = vrot.slane %v1803_v44, 2  ;;  %v1740_v50 = vmax.f32 %v1738_v38, %v1739_v6 }
 0x26b   : > { %v1735_v37 = vmax.f32 %v1733_v7, %v1734_v60  ;;  %v1747_v30 = vmax.f32 %v1745_v19, %v1746_v31  ;;  %v1753_v21 = vrot.slane %v1752_v5, 4  ;;  %v1811_v18 = vrot.slane %v1810_v20, 2 }
 0x26c   : > { %v1792_v49 = vrot.slane %v1791_v62, 1  ;;  %v1798_v59 = vmax.f32 %v1796_v1, %v1797_v28  ;;  %v1805_v43 = vmax.f32 %v1803_v44, %v1804_v63  ;;  %v1741_v25 = vrot.slane %v1740_v50, 2 }
 0x26d   : > { %v1736_v42 = vrot.slane %v1735_v37, 1  ;;  %v1748_v58 = vrot.slane %v1747_v30, 2  ;;  %v1754_v3 = vmax.f32 %v1752_v5, %v1753_v21  ;;  %v1812_v56 = vmax.f32 %v1810_v20, %v1811_v18 }
 0x26e   : > { %v3676_v34 = vmax.f32 %v1791_v62, %v1792_v49  ;;  %v1799_v12 = vrot.slane %v1798_v59, 1  ;;  %v1806_v27 = vrot.slane %v1805_v43, 1  ;;  %v1742_v33 = vmax.f32 %v1740_v50, %v1741_v25 }
 0x26f   : > { %v3678_v35 = vmax.f32 %v1735_v37, %v1736_v42  ;;  %v1749_v7 = vmax.f32 %v1747_v30, %v1748_v58  ;;  %v1755_v38 = vrot.slane %v1754_v3, 2  ;;  %v1813_v28 = vrot.slane %v1812_v56, 1 }
 0x270   : > { %4507 = vst [vmem:[#allocation55_spill] sm:$0xff] %v3676_v34  ;;  %v3680_v19 = vmax.f32 %v1798_v59, %v1799_v12  ;;  %v3682_v53 = vmax.f32 %v1805_v43, %v1806_v27  ;;  %v940_v63 = vrot.slane %v3647_v9, %v3153_v10  ;;  %v1743_v1 = vrot.slane %v1742_v33, 1 }
 0x271   : > { %4508 = vst [vmem:[#allocation56_spill] sm:$0xff] %v3678_v35  ;;  %v1750_v21 = vrot.slane %v1749_v7, 1  ;;  %v1756_v44 = vmax.f32 %v1754_v3, %v1755_v38  ;;  %v3688_v6 = vmax.f32 %v1812_v56, %v1813_v28  ;;  %v947_v31 = vrot.slane %v933_v8, %v3153_v10  ;;  %v4548_v35 = vld [vmem:[#allocation2_spill] sm:$0xff] }
 0x272   : > { %4509 = vst [vmem:[#allocation57_spill] sm:$0xff] %v3680_v19  ;;  %4510 = vst [vmem:[#allocation58_spill] sm:$0xff] %v3682_v53  ;;  %v948_v58 = vcombine.high %v940_v63, %v940_v63  ;;  %v1815_v59 = vsel %vm1282_vm1, %v940_v63, -inf  ;;  %v3692_v12 = vmax.f32 %v1742_v33, %v1743_v1  ;;  %v899_v56 = vcombine.high %v3658_v48, %v3658_v48 }
 0x273   : > { %4511 = vst [vmem:[#allocation59_spill] sm:$0xff] %v3688_v6  ;;  %v3694_v5 = vmax.f32 %v1749_v7, %v1750_v21  ;;  %v1757_v62 = vrot.slane %v1756_v44, 1  ;;  %v1816_v20 = vrot.slane %v1815_v59, 4  ;;  %v949_v37 = vcombine.high %v947_v31, %v947_v31 }
 0x274   : > { %4512 = vst [vmem:[#allocation60_spill] sm:$0xff] %v3692_v12  ;;  %v1822_v50 = vsel %vm1282_vm1, %v948_v58, -inf  ;;  %v1829_v3 = vsel %vm1282_vm1, %v947_v31, -inf  ;;  %v906_v38 = vrot.slane %v3658_v48, %v3153_v10  ;;  %v913_v21 = vrot.slane %v899_v56, %v3153_v10 }
 0x275   : > { %4513 = vst [vmem:[#allocation61_spill] sm:$0xff] %v3694_v5  ;;  %v3700_v49 = vmax.f32 %v1756_v44, %v1757_v62  ;;  %v1817_v18 = vmax.f32 %v1815_v59, %v1816_v20  ;;  %v1823_v42 = vrot.slane %v1822_v50, 4  ;;  %v1830_v25 = vrot.slane %v1829_v3, 4 }
 0x276   : > { %v1836_v27 = vsel %vm1282_vm1, %v949_v37, -inf  ;;  %v4515_v44 = vrot.slane %v3405_v0, 1  ;;  %v914_v62 = vcombine.high %v906_v38, %v906_v38  ;;  %v1759_v20 = vsel %vm1282_vm1, %v906_v38, -inf }
 0x277   : > { %4514 = vst [vmem:[#allocation62_spill] sm:$0xff] %v3700_v49  ;;  %v1818_v33 = vrot.slane %v1817_v18, 2  ;;  %v1837_v7 = vrot.slane %v1836_v27, 4  ;;  %v1824_v63 = vmax.f32 %v1822_v50, %v1823_v42  ;;  %v1831_v1 = vmax.f32 %v1829_v3, %v1830_v25 }
 0x278   : > { %v3717_v31 = vmax.f32 %v3405_v0, %v4515_v44  ;;  %v915_v8 = vcombine.high %v913_v21, %v913_v21  ;;  %v1760_v60 = vrot.slane %v1759_v20, 4  ;;  %v1766_v50 = vsel %vm1282_vm1, %v914_v62, -inf }
 0x279   : > { %v1819_v58 = vmax.f32 %v1817_v18, %v1818_v33  ;;  %v3719_v59 = vmax.f32 %v1836_v27, %v1837_v7  ;;  %v1825_v37 = vrot.slane %v1824_v63, 2  ;;  %v1832_v43 = vrot.slane %v1831_v1, 2 }
 0x27a   : > { %v1773_v3 = vsel %vm1282_vm1, %v913_v21, -inf  ;;  %v1442_v42 = vrot.slane %v3407_v22, 1  ;;  %v1761_v18 = vmax.f32 %v1759_v20, %v1760_v60  ;;  %v1767_v27 = vrot.slane %v1766_v50, 4 }
 0x27b   : > { %4516 = vst [vmem:[#allocation63_spill] sm:$0xff] %v3719_v59  ;;  %v1820_v30 = vrot.slane %v1819_v58, 1  ;;  %v3725_v25 = vmax.f32 %v1824_v63, %v1825_v37  ;;  %v3727_v0 = vmax.f32 %v1831_v1, %v1832_v43  ;;  %v1774_v33 = vrot.slane %v1773_v3, 4  ;;  %v4519_v1 = vld [vmem:[#allocation21_spill] sm:$0xff] }
 0x27c   : > { %v1780_v7 = vsel %vm1282_vm1, %v915_v8, -inf  ;;  %v1443_v38 = vmax.f32 %v3407_v22, %v1442_v42  ;;  %v1762_v62 = vrot.slane %v1761_v18, 2  ;;  %v1768_v28 = vmax.f32 %v1766_v50, %v1767_v27  ;;  %v4520_v8 = vld [vmem:[#allocation18_spill] sm:$0xff]  ;;  %v4522_v27 = vld [vmem:[#allocation19_spill] sm:$0xff] }
 0x27d   : > { %v3729_v56 = vmax.f32 %v1819_v58, %v1820_v30  ;;  %v1781_v21 = vrot.slane %v1780_v7, 4  ;;  %v1775_v53 = vmax.f32 %v1773_v3, %v1774_v33  ;;  %v1447_v63 = vrot.slane %v3402_v4, 2  ;;  %v4521_v3 = vld [vmem:[#allocation13_spill] sm:$0xff] }
 0x27e   : > { %v4518_v43 = vrot.slane %v3353_v41, 1  ;;  %v1498_v30 = vrot.slane %v4519_v1, 1  ;;  %v1763_v58 = vmax.f32 %v1761_v18, %v1762_v62  ;;  %v1769_v20 = vrot.slane %v1768_v28, 2  ;;  %v4524_v18 = vld [vmem:[#allocation28_spill] sm:$0xff] }
 0x27f   : > { %4517 = vst [vmem:[#allocation64_spill] sm:$0xff] %v3729_v56  ;;  %v3739_v37 = vmax.f32 %v1780_v7, %v1781_v21  ;;  %v1503_v22 = vrot.slane %v4520_v8, 2  ;;  %v1776_v42 = vrot.slane %v1775_v53, 2  ;;  %v1448_v44 = vmax.f32 %v3402_v4, %v1447_v63 }
 0x280   : > { %v1492_v60 = vmax.f32 %v3353_v41, %v4518_v43  ;;  %v1499_v50 = vmax.f32 %v4519_v1, %v1498_v30  ;;  %v2190_v33 = vmax.f32 %v4522_v27, %v4521_v3  ;;  %v1764_v5 = vrot.slane %v1763_v58, 1  ;;  %v4523_v43 = vld [vmem:[#allocation23_spill] sm:$0xff]  ;;  %v4527_v3 = vld [vmem:[#allocation10_spill] sm:$0xff] }
 0x281   : > { %v3746_v19 = vmax.f32 %v1768_v28, %v1769_v20  ;;  %v1504_v41 = vmax.f32 %v4520_v8, %v1503_v22  ;;  %v2191_v62 = vmax.f32 %v4524_v18, %v4523_v43  ;;  %v3751_v7 = vmax.f32 %v1775_v53, %v1776_v42  ;;  %v4526_v30 = vld [vmem:[#allocation15_spill] sm:$0xff]  ;;  %v4529_v20 = vld [vmem:[#allocation16_spill] sm:$0xff]  ;;  %v4532_v53 = vld [vmem:[#allocation17_spill] sm:$0xff] }
 0x282   : > { %v1449_v21 = vrot.slane %v1448_v44, 1  ;;  %v2192_v12 = vmax.f32 %v3717_v31, %v1492_v60  ;;  %v2193_v34 = vmax.f32 %v1443_v38, %v1499_v50  ;;  %v3754_v4 = vmax.f32 %v1763_v58, %v1764_v5  ;;  %v4530_v27 = vld [vmem:[#allocation11_spill] sm:$0xff]  ;;  %v4533_v42 = vld [vmem:[#allocation12_spill] sm:$0xff]  ;;  %v4535_v38 = vld [vmem:[#allocation14_spill] sm:$0xff] }
 0x283   : > { %v1505_v1 = vrot.slane %v1504_v41, 1  ;;  %v4528_v28 = vmax.f32 %v4526_v30, %v4527_v3  ;;  %v4531_v8 = vmax.f32 %v4529_v20, %v4530_v27  ;;  %v4534_v18 = vmax.f32 %v4532_v53, %v4533_v42  ;;  %v4539_v30 = vld [vmem:[#allocation22_spill] sm:$0xff]  ;;  %v4541_v20 = vld [vmem:[#allocation27_spill] sm:$0xff]  ;;  %v4542_v42 = vld [vmem:[#allocation5_spill] sm:$0xff] }
 0x284   : > { %4525 = vst [vmem:[#allocation21_spill] sm:$0xff] %v3754_v4  ;;  %v1450_v43 = vmax.f32 %v1448_v44, %v1449_v21  ;;  %v3770_v5 = vadd.f32 %v3624_v24, %v4535_v38  ;;  %v4538_v44 = vld [vmem:[#allocation20_spill] sm:$0xff]  ;;  %v3785_v3 = vadd.f32 %v3624_v24, %v4539_v30  ;;  %v3799_v27 = vadd.f32 %v3624_v24, %v4541_v20 }
 0x285   : > { %v2321_v22 = vsel %vm2307_vm2, %v4531_v8, %v4528_v28  ;;  %v1506_v60 = vmax.f32 %v1504_v41, %v1505_v1  ;;  %v3781_v21 = vadd.f32 %v3624_v24, %v4538_v44  ;;  %v4540_v1 = vpack.c.bf16 %v3658_v48, %v3638_v36 }
 0x286   : > { %v2322_v31 = vsel %vm2309_vm3, %v4534_v18, %v2321_v22  ;;  %v984_v41 = vcombine.high %v3770_v5, %v3770_v5  ;;  %v4543_v18 = vld [vmem:[#allocation3_spill] sm:$0xff] }
 0x287   : > { %v2323_v58 = vsel %vm2311_vm4, %v2190_v33, %v2322_v31  ;;  %v991_v33 = vrot.slane %v3770_v5, %v3153_v10  ;;  %2961 = vmatprep.subr.msk.bf16.mxu0 %vm3775_vm10, %v4540_v1  ;;  %v2194_v8 = vmax.f32 %v1450_v43, %v1506_v60  ;;  %v957_v53 = vrot.slane %v3781_v21, %v3153_v10 }
 0x288   : > { %v2324_v28 = vsel %vm2313_vm5, %v2191_v62, %v2323_v58  ;;  %v950_v62 = vcombine.high %v3781_v21, %v3781_v21  ;;  %v4544_v31 = vpack.c.bf16 %v4542_v42, %v4543_v18  ;;  %v998_v48 = vrot.slane %v984_v41, %v3153_v10 }
 0x289   : > { %v2325_v22 = vsel %vm2315_vm6, %v2192_v12, %v2324_v28  ;;  %v999_v38 = vcombine.high %v991_v33, %v991_v33  ;;  %v1899_v43 = vsel %vm1282_vm1, %v991_v33, -inf  ;;  %v4545_v12 = vpack.c.bf16 %v3647_v9, %v3628_v40 }
 0x28a   : > { %2964 = vmatpush3.bf16.xpose.msk.msra.mxu0 %vm3775_vm10, %v4544_v31  ;;  %v2326_v36 = vsel %vm2317_vm7, %v2193_v34, %v2325_v22  ;;  %v1900_v58 = vrot.slane %v1899_v43, 4  ;;  %v964_v44 = vrot.slane %v950_v62, %v3153_v10  ;;  %v965_v30 = vcombine.high %v957_v53, %v957_v53 }
 0x28b   : > { %2967 = vmatprep.subr.msk.bf16.mxu0 %vm3775_vm10, %v4545_v12  ;;  %v3820_v60 = vsel %vm2319_vm8, %v2194_v8, %v2326_v36  ;;  %v1000_v28 = vcombine.high %v998_v48, %v998_v48  ;;  %v1906_v41 = vsel %vm1282_vm1, %v999_v38, -inf  ;;  %v1913_v40 = vsel %vm1282_vm1, %v998_v48, -inf }
 0x28c   : > { %4546 = vst [vmem:[#allocation18_spill] sm:$0xff] %v3820_v60  ;;  %2372 = vrot.lane.b32.xlu1 %v3820_v60, %s3061_s15  ;;  %v1901_v9 = vmax.f32 %v1899_v43, %v1900_v58  ;;  %v1907_v33 = vrot.slane %v1906_v41, 4  ;;  %v1914_v1 = vrot.slane %v1913_v40, 4  ;;  %v966_v20 = vcombine.high %v964_v44, %v964_v44 }
 0x28d   : > { %v1920_v8 = vsel %vm1282_vm1, %v1000_v28, -inf  ;;  %v1843_v22 = vsel %vm1282_vm1, %v957_v53, -inf  ;;  %v1850_v62 = vsel %vm1282_vm1, %v965_v30, -inf  ;;  %v1857_v42 = vsel %vm1282_vm1, %v964_v44, -inf  ;;  %v4547_v28 = vld [vmem:[#allocation4_spill] sm:$0xff] }
 0x28e   : > { %v1902_v18 = vrot.slane %v1901_v9, 2  ;;  %v1908_v31 = vmax.f32 %v1906_v41, %v1907_v33  ;;  %v1915_v36 = vmax.f32 %v1913_v40, %v1914_v1  ;;  %v1921_v12 = vrot.slane %v1920_v8, 4 }
 0x28f   : > { %v1844_v34 = vrot.slane %v1843_v22, 4  ;;  %v1851_v38 = vrot.slane %v1850_v62, 4  ;;  %v1858_v63 = vrot.slane %v1857_v42, 4  ;;  %v1864_v48 = vsel %vm1282_vm1, %v966_v20, -inf }
 0x290   : > { %v1903_v43 = vmax.f32 %v1901_v9, %v1902_v18  ;;  %v1909_v58 = vrot.slane %v1908_v31, 2  ;;  %v1916_v11 = vrot.slane %v1915_v36, 2  ;;  %v1922_v60 = vmax.f32 %v1920_v8, %v1921_v12 }
 0x291   : > { %v4549_v53 = vpack.c.bf16 %v4547_v28, %v4548_v35  ;;  %v1845_v44 = vmax.f32 %v1843_v22, %v1844_v34  ;;  %v1852_v30 = vmax.f32 %v1850_v62, %v1851_v38  ;;  %v1859_v41 = vmax.f32 %v1857_v42, %v1858_v63 }
 0x292   : > { %v1865_v40 = vrot.slane %v1864_v48, 4  ;;  %v1904_v33 = vrot.slane %v1903_v43, 1  ;;  %v1910_v1 = vmax.f32 %v1908_v31, %v1909_v58  ;;  %v1917_v4 = vmax.f32 %v1915_v36, %v1916_v11 }
 0x293   : > { %2970 = vmatpush3.bf16.xpose.msk.msra.mxu0 %vm3775_vm10, %v4549_v53  ;;  %v1923_v56 = vrot.slane %v1922_v60, 2  ;;  %v1846_v49 = vrot.slane %v1845_v44, 2  ;;  %v1853_v20 = vrot.slane %v1852_v30, 2  ;;  %v1860_v9 = vrot.slane %v1859_v41, 2 }
 0x294   : > { %v1866_v18 = vmax.f32 %v1864_v48, %v1865_v40  ;;  %v3839_v6 = vmax.f32 %v1903_v43, %v1904_v33  ;;  %v1911_v8 = vrot.slane %v1910_v1, 1  ;;  %v1918_v12 = vrot.slane %v1917_v4, 1 }
 0x295   : > { %v1924_v35 = vmax.f32 %v1922_v60, %v1923_v56  ;;  %v1847_v28 = vmax.f32 %v1845_v44, %v1846_v49  ;;  %v1854_v59 = vmax.f32 %v1852_v30, %v1853_v20  ;;  %v1861_v53 = vmax.f32 %v1859_v41, %v1860_v9  ;;  %v4571_v20 = vld [vmem:[#allocation32_spill] sm:$0xff] }
 0x296   : > { %4550 = vst [vmem:[#allocation13_spill] sm:$0xff] %v3839_v6  ;;  %v1867_v34 = vrot.slane %v1866_v18, 2  ;;  %v3841_v22 = vmax.f32 %v1910_v1, %v1911_v8  ;;  %v3843_v63 = vmax.f32 %v1917_v4, %v1918_v12  ;;  %v1001_v11 = vcombine.high %v3785_v3, %v3785_v3 }
 0x297   : > { %v1925_v62 = vrot.slane %v1924_v35, 1  ;;  %v1848_v42 = vrot.slane %v1847_v28, 1  ;;  %v1855_v31 = vrot.slane %v1854_v59, 1  ;;  %v1862_v36 = vrot.slane %v1861_v53, 1 }
 0x298   : > { %4551 = vst [vmem:[#allocation19_spill] sm:$0xff] %v3841_v22  ;;  %4552 = vst [vmem:[#allocation23_spill] sm:$0xff] %v3843_v63  ;;  %v1868_v38 = vmax.f32 %v1866_v18, %v1867_v34  ;;  %v1008_v49 = vrot.slane %v3785_v3, %v3153_v10  ;;  %v1015_v56 = vrot.slane %v1001_v11, %v3153_v10  ;;  %v4585_v22 = vld [vmem:[#allocation36_spill] sm:$0xff] }
 0x299   : > { %v3847_v48 = vmax.f32 %v1924_v35, %v1925_v62  ;;  %v2977_v60 = vpack.c.bf16 %v3785_v3, %v3770_v5  ;;  %v3854_v4 = vmax.f32 %v1847_v28, %v1848_v42  ;;  %v3856_v43 = vmax.f32 %v1854_v59, %v1855_v31 }
 0x29a   : > { %v3858_v58 = vmax.f32 %v1861_v53, %v1862_v36  ;;  %v1869_v44 = vrot.slane %v1868_v38, 1  ;;  %v1016_v30 = vcombine.high %v1008_v49, %v1008_v49  ;;  %v1017_v41 = vcombine.high %v1015_v56, %v1015_v56 }
 0x29b   : > { %4553 = vst [vmem:[#allocation28_spill] sm:$0xff] %v3847_v48  ;;  %4554 = vst [vmem:[#allocation15_spill] sm:$0xff] %v3854_v4  ;;  %v1927_v40 = vsel %vm1282_vm1, %v1008_v49, -inf  ;;  %v1941_v33 = vsel %vm1282_vm1, %v1015_v56, -inf  ;;  %v967_v28 = vcombine.high %v3799_v27, %v3799_v27  ;;  %v974_v53 = vrot.slane %v3799_v27, %v3153_v10 }
 0x29c   : > { %4555 = vst [vmem:[#allocation10_spill] sm:$0xff] %v3856_v43  ;;  %4556 = vst [vmem:[#allocation16_spill] sm:$0xff] %v3858_v58  ;;  %v3862_v1 = vmax.f32 %v1868_v38, %v1869_v44  ;;  %v1928_v3 = vrot.slane %v1927_v40, 4  ;;  %v1934_v9 = vsel %vm1282_vm1, %v1016_v30, -inf  ;;  %v1942_v18 = vrot.slane %v1941_v33, 4 }
 0x29d   : > { %v1948_v8 = vsel %vm1282_vm1, %v1017_v41, -inf  ;;  %v1935_v12 = vrot.slane %v1934_v9, 4  ;;  %v2971_v11 = vpack.c.bf16 %v3799_v27, %v3781_v21  ;;  %v4558_v42 = vrot.slane %v3502_v29, 1 }
 0x29e   : > { %4557 = vst [vmem:[#allocation11_spill] sm:$0xff] %v3862_v1  ;;  %v1949_v35 = vrot.slane %v1948_v8, 4  ;;  %v1929_v34 = vmax.f32 %v1927_v40, %v1928_v3  ;;  %v1943_v62 = vmax.f32 %v1941_v33, %v1942_v18  ;;  %v981_v49 = vrot.slane %v967_v28, %v3153_v10  ;;  %v4560_v3 = vld [vmem:[#allocation9_spill] sm:$0xff] }
 0x29f   : > { %v3881_v31 = vmax.f32 %v3502_v29, %v4558_v42  ;;  %v1936_v36 = vmax.f32 %v1934_v9, %v1935_v12  ;;  %v982_v56 = vcombine.high %v974_v53, %v974_v53  ;;  %v1871_v41 = vsel %vm1282_vm1, %v974_v53, -inf  ;;  %2973 = vmatprep.subr.msk.bf16.mxu0 %vm3775_vm10, %v2971_v11  ;;  %v4561_v9 = vld [vmem:[#allocation7_spill] sm:$0xff] }
 0x2a0   : > { %v3883_v38 = vmax.f32 %v1948_v8, %v1949_v35  ;;  %v1930_v44 = vrot.slane %v1929_v34, 2  ;;  %v1944_v30 = vrot.slane %v1943_v62, 2  ;;  %v1554_v40 = vrot.slane %v3497_v57, 1 }
 0x2a1   : > { %v1937_v21 = vrot.slane %v1936_v36, 2  ;;  %v983_v27 = vcombine.high %v981_v49, %v981_v49  ;;  %v1872_v33 = vrot.slane %v1871_v41, 4  ;;  %v1878_v29 = vsel %vm1282_vm1, %v982_v56, -inf }
 0x2a2   : > { %4559 = vst [vmem:[#allocation17_spill] sm:$0xff] %v3883_v38  ;;  %v4562_v18 = vpack.c.bf16 %v4560_v3, %v4561_v9  ;;  %v1931_v8 = vmax.f32 %v1929_v34, %v1930_v44  ;;  %v3896_v12 = vmax.f32 %v1943_v62, %v1944_v30  ;;  %v1879_v35 = vrot.slane %v1878_v29, 4  ;;  %v4573_v34 = vld [vmem:[#allocation43_spill] sm:$0xff] }
 0x2a3   : > { %v1885_v28 = vsel %vm1282_vm1, %v981_v49, -inf  ;;  %v3901_v53 = vmax.f32 %v1936_v36, %v1937_v21  ;;  %v1873_v11 = vmax.f32 %v1871_v41, %v1872_v33  ;;  %v1892_v56 = vsel %vm1282_vm1, %v983_v27, -inf  ;;  %v4567_v41 = vld [vmem:[#allocation41_spill] sm:$0xff] }
 0x2a4   : > { %2976 = vmatpush3.bf16.xpose.msk.msra.mxu0 %vm3775_vm10, %v4562_v18  ;;  %4563 = vst [vmem:[#allocation12_spill] sm:$0xff] %v3896_v12  ;;  %v1886_v42 = vrot.slane %v1885_v28, 4  ;;  %v1932_v59 = vrot.slane %v1931_v8, 1  ;;  %v1880_v3 = vmax.f32 %v1878_v29, %v1879_v35  ;;  %v1893_v9 = vrot.slane %v1892_v56, 4 }
 0x2a5   : > { %2979 = vmatprep.subr.msk.bf16.mxu0 %vm3775_vm10, %v2977_v60  ;;  %4564 = vst [vmem:[#allocation14_spill] sm:$0xff] %v3901_v53  ;;  %v1555_v18 = vmax.f32 %v3497_v57, %v1554_v40  ;;  %v1874_v62 = vrot.slane %v1873_v11, 2  ;;  %v1559_v49 = vrot.slane %v3487_v13, 2  ;;  %v4568_v21 = vrot.slane %v4567_v41, 1  ;;  %v4569_v57 = vld [vmem:[#allocation42_spill] sm:$0xff] }
 0x2a6   : > { %v1887_v44 = vmax.f32 %v1885_v28, %v1886_v42  ;;  %v3907_v30 = vmax.f32 %v1931_v8, %v1932_v59  ;;  %v1881_v60 = vrot.slane %v1880_v3, 2  ;;  %v3909_v36 = vmax.f32 %v1892_v56, %v1893_v9  ;;  %v4570_v28 = vld [vmem:[#allocation38_spill] sm:$0xff]  ;;  %v4572_v59 = vld [vmem:[#allocation37_spill] sm:$0xff]  ;;  %v4574_v56 = vld [vmem:[#allocation48_spill] sm:$0xff] }
 0x2a7   : > { %v1604_v27 = vmax.f32 %v4567_v41, %v4568_v21  ;;  %v1875_v33 = vmax.f32 %v1873_v11, %v1874_v62  ;;  %v1560_v35 = vmax.f32 %v3487_v13, %v1559_v49  ;;  %v1610_v40 = vrot.slane %v4569_v57, 1  ;;  %v4575_v62 = vld [vmem:[#allocation8_spill] sm:$0xff]  ;;  %v4576_v13 = vld [vmem:[#allocation6_spill] sm:$0xff] }
 0x2a8   : > { %4565 = vst [vmem:[#allocation20_spill] sm:$0xff] %v3907_v30  ;;  %4566 = vst [vmem:[#allocation22_spill] sm:$0xff] %v3909_v36  ;;  %v1888_v29 = vrot.slane %v1887_v44, 2  ;;  %v3916_v5 = vmax.f32 %v1880_v3, %v1881_v60  ;;  %v1615_v42 = vrot.slane %v4570_v28, 2  ;;  %v2198_v8 = vmax.f32 %v4572_v59, %v4571_v20  ;;  %v4578_v21 = vld [vmem:[#allocation34_spill] sm:$0xff] }
 0x2a9   : > { %v2199_v9 = vmax.f32 %v4574_v56, %v4573_v34  ;;  %v1876_v63 = vrot.slane %v1875_v33, 1  ;;  %v1561_v41 = vrot.slane %v1560_v35, 1  ;;  %v1611_v11 = vmax.f32 %v4569_v57, %v1610_v40  ;;  %v4579_v34 = vld [vmem:[#allocation29_spill] sm:$0xff] }
 0x2aa   : > { %v3923_v58 = vmax.f32 %v1887_v44, %v1888_v29  ;;  %v4577_v49 = vpack.c.bf16 %v4575_v62, %v4576_v13  ;;  %v1616_v60 = vmax.f32 %v4570_v28, %v1615_v42  ;;  %v2200_v20 = vmax.f32 %v3881_v31, %v1604_v27  ;;  %v4581_v44 = vld [vmem:[#allocation35_spill] sm:$0xff]  ;;  %v4582_v29 = vld [vmem:[#allocation30_spill] sm:$0xff]  ;;  %v4588_v27 = vld [vmem:[#allocation40_spill] sm:$0xff] }
 0x2ab   : > { %v4580_v59 = vmax.f32 %v4578_v21, %v4579_v34  ;;  %v4583_v56 = vmax.f32 %v4581_v44, %v4582_v29  ;;  %v3941_v40 = vmax.f32 %v1875_v33, %v1876_v63  ;;  %v1562_v62 = vmax.f32 %v1560_v35, %v1561_v41  ;;  %v4589_v21 = vld [vmem:[#allocation46_spill] sm:$0xff]  ;;  %v4590_v33 = vld [vmem:[#allocation47_spill] sm:$0xff] }
 0x2ac   : > { %2982 = vmatpush3.bf16.xpose.msk.msra.mxu0 %vm3775_vm10, %v4577_v49  ;;  %v2201_v13 = vmax.f32 %v1555_v18, %v1611_v11  ;;  %v4586_v49 = vld [vmem:[#allocation31_spill] sm:$0xff]  ;;  %v1617_v28 = vrot.slane %v1616_v60, 1  ;;  %v3950_v42 = vadd.f32 %v3624_v24, %v4588_v27  ;;  %v3954_v34 = vadd.f32 %v3624_v24, %v4589_v21 }
 0x2ad   : > { %v2328_v57 = vsel %vm2307_vm2, %v4583_v56, %v4580_v59  ;;  %4584 = vst [vmem:[#allocation27_spill] sm:$0xff] %v3941_v40  ;;  %v4587_v43 = vmax.f32 %v4585_v22, %v4586_v49  ;;  %v3959_v18 = vadd.f32 %v3624_v24, %v4590_v33  ;;  %v4591_v22 = vld [vmem:[#allocation49_spill] sm:$0xff]  ;;  %v4592_v35 = vrot.slane %v3613_v16, 1 }
 0x2ae   : > { %v1618_v41 = vmax.f32 %v1616_v60, %v1617_v28  ;;  %v1018_v44 = vcombine.high %v3954_v34, %v3954_v34  ;;  %v1025_v29 = vrot.slane %v3954_v34, %v3153_v10 }
 0x2af   : > { %v2329_v3 = vsel %vm2309_vm3, %v4587_v43, %v2328_v57  ;;  %v3963_v43 = vadd.f32 %v3624_v24, %v4591_v22 }
 0x2b0   : > { %v2330_v31 = vsel %vm2311_vm4, %v2198_v8, %v2329_v3  ;;  %v3968_v8 = vmax.f32 %v3613_v16, %v4592_v35  ;;  %v1052_v3 = vcombine.high %v3950_v42, %v3950_v42  ;;  %v2202_v60 = vmax.f32 %v1562_v62, %v1618_v41 }
 0x2b1   : > { %v2331_v63 = vsel %vm2313_vm5, %v2199_v9, %v2330_v31  ;;  %v1059_v9 = vrot.slane %v3950_v42, %v3153_v10  ;;  %v1032_v28 = vrot.slane %v1018_v44, %v3153_v10  ;;  %v1033_v31 = vcombine.high %v1025_v29, %v1025_v29 }
 0x2b2   : > { %v2332_v11 = vsel %vm2315_vm6, %v2200_v20, %v2331_v63  ;;  %v1066_v20 = vrot.slane %v1052_v3, %v3153_v10 }
 0x2b3   : > { %v2333_v59 = vsel %vm2317_vm7, %v2201_v13, %v2332_v11  ;;  %v1067_v56 = vcombine.high %v1059_v9, %v1059_v9  ;;  %v2011_v57 = vsel %vm1282_vm1, %v1059_v9, -inf  ;;  %v1955_v13 = vsel %vm1282_vm1, %v1025_v29, -inf }
 0x2b4   : > { %v2012_v49 = vrot.slane %v2011_v57, 4  ;;  %v3987_v27 = vsel %vm2319_vm8, %v2202_v60, %v2333_v59  ;;  %v1068_v21 = vcombine.high %v1066_v20, %v1066_v20  ;;  %v2025_v33 = vsel %vm1282_vm1, %v1066_v20, -inf }
 0x2b5   : > { %v2018_v63 = vsel %vm1282_vm1, %v1067_v56, -inf  ;;  %2374 = vrot.lane.b32.xlu1 %v3987_v27, %s3061_s15  ;;  %v2026_v35 = vrot.slane %v2025_v33, 4  ;;  %v1034_v41 = vcombine.high %v1032_v28, %v1032_v28  ;;  %v1956_v3 = vrot.slane %v1955_v13, 4 }
 0x2b6   : > { %v2013_v62 = vmax.f32 %v2011_v57, %v2012_v49  ;;  %v2019_v22 = vrot.slane %v2018_v63, 4  ;;  %v2032_v11 = vsel %vm1282_vm1, %v1068_v21, -inf  ;;  %v1962_v9 = vsel %vm1282_vm1, %v1033_v31, -inf }
 0x2b7   : > { %v1969_v59 = vsel %vm1282_vm1, %v1032_v28, -inf  ;;  %v2027_v60 = vmax.f32 %v2025_v33, %v2026_v35  ;;  %v2033_v56 = vrot.slane %v2032_v11, 4  ;;  %v1957_v16 = vmax.f32 %v1955_v13, %v1956_v3 }
 0x2b8   : > { %v2014_v44 = vrot.slane %v2013_v62, 2  ;;  %v2020_v29 = vmax.f32 %v2018_v63, %v2019_v22  ;;  %v1963_v20 = vrot.slane %v1962_v9, 4  ;;  %v1970_v6 = vrot.slane %v1969_v59, 4 }
 0x2b9   : > { %v1976_v4 = vsel %vm1282_vm1, %v1034_v41, -inf  ;;  %v2028_v40 = vrot.slane %v2027_v60, 2  ;;  %v2034_v30 = vmax.f32 %v2032_v11, %v2033_v56  ;;  %v1958_v1 = vrot.slane %v1957_v16, 2 }
 0x2ba   : > { %v2015_v57 = vmax.f32 %v2013_v62, %v2014_v44  ;;  %v2021_v49 = vrot.slane %v2020_v29, 2  ;;  %v1964_v21 = vmax.f32 %v1962_v9, %v1963_v20  ;;  %v1971_v48 = vmax.f32 %v1969_v59, %v1970_v6 }
 0x2bb   : > { %v1977_v38 = vrot.slane %v1976_v4, 4  ;;  %v2029_v28 = vmax.f32 %v2027_v60, %v2028_v40  ;;  %v2035_v53 = vrot.slane %v2034_v30, 2  ;;  %v1959_v63 = vmax.f32 %v1957_v16, %v1958_v1 }
 0x2bc   : > { %v2016_v31 = vrot.slane %v2015_v57, 1  ;;  %v2022_v12 = vmax.f32 %v2020_v29, %v2021_v49  ;;  %v1965_v33 = vrot.slane %v1964_v21, 2  ;;  %v1972_v22 = vrot.slane %v1971_v48, 2 }
 0x2bd   : > { %v1978_v13 = vmax.f32 %v1976_v4, %v1977_v38  ;;  %v2030_v41 = vrot.slane %v2029_v28, 1  ;;  %v2036_v62 = vmax.f32 %v2034_v30, %v2035_v53  ;;  %v1960_v44 = vrot.slane %v1959_v63, 1 }
 0x2be   : > { %v3997_v35 = vmax.f32 %v2015_v57, %v2016_v31  ;;  %v2023_v3 = vrot.slane %v2022_v12, 1  ;;  %v1966_v36 = vmax.f32 %v1964_v21, %v1965_v33  ;;  %v1973_v11 = vmax.f32 %v1971_v48, %v1972_v22 }
 0x2bf   : > { %v1979_v56 = vrot.slane %v1978_v13, 2  ;;  %v4001_v6 = vmax.f32 %v2029_v28, %v2030_v41  ;;  %v2037_v59 = vrot.slane %v2036_v62, 1  ;;  %v1076_v1 = vrot.slane %v3959_v18, %v3153_v10 }
 0x2c0   : > { %v3999_v9 = vmax.f32 %v2022_v12, %v2023_v3  ;;  %v4005_v40 = vmax.f32 %v1959_v63, %v1960_v44  ;;  %v1967_v4 = vrot.slane %v1966_v36, 1  ;;  %v1974_v38 = vrot.slane %v1973_v11, 1 }
 0x2c1   : > { %v1980_v16 = vmax.f32 %v1978_v13, %v1979_v56  ;;  %v4007_v29 = vmax.f32 %v2036_v62, %v2037_v59  ;;  %v4593_v48 = vcombine.high %v3959_v18, %v3959_v18  ;;  %v1084_v12 = vcombine.high %v1076_v1, %v1076_v1 }
 0x2c2   : > { %v2039_v30 = vsel %vm1282_vm1, %v1076_v1, -inf  ;;  %v4014_v60 = vmax.f32 %v1966_v36, %v1967_v4  ;;  %v4016_v20 = vmax.f32 %v1973_v11, %v1974_v38  ;;  %v2989_v44 = vpack.c.bf16 %v3959_v18, %v3950_v42 }
 0x2c3   : > { %v1083_v53 = vrot.slane %v4593_v48, %v3153_v10  ;;  %v1981_v57 = vrot.slane %v1980_v16, 1  ;;  %v2040_v31 = vrot.slane %v2039_v30, 4  ;;  %v2046_v28 = vsel %vm1282_vm1, %v1084_v12, -inf }
 0x2c4   : > { %v2047_v13 = vrot.slane %v2046_v28, 4  ;;  %v1035_v59 = vcombine.high %v3963_v43, %v3963_v43  ;;  %v1042_v1 = vrot.slane %v3963_v43, %v3153_v10  ;;  %v1666_v48 = vrot.slane %v3615_v23, 1 }
 0x2c5   : > { %v1085_v21 = vcombine.high %v1083_v53, %v1083_v53  ;;  %v2053_v63 = vsel %vm1282_vm1, %v1083_v53, -inf  ;;  %v4022_v33 = vmax.f32 %v1980_v16, %v1981_v57  ;;  %v2041_v3 = vmax.f32 %v2039_v30, %v2040_v31 }
 0x2c6   : > { %v2054_v41 = vrot.slane %v2053_v63, 4  ;;  %v2048_v11 = vmax.f32 %v2046_v28, %v2047_v13  ;;  %v2983_v16 = vpack.c.bf16 %v3963_v43, %v3954_v34  ;;  %v1049_v42 = vrot.slane %v1035_v59, %v3153_v10  ;;  %v4594_v13 = vld [vmem:[#allocation33_spill] sm:$0xff] }
 0x2c7   : > { %v2060_v62 = vsel %vm1282_vm1, %v1085_v21, -inf  ;;  %v2042_v4 = vrot.slane %v2041_v3, 2  ;;  %v1050_v18 = vcombine.high %v1042_v1, %v1042_v1  ;;  %v1983_v21 = vsel %vm1282_vm1, %v1042_v1, -inf }
 0x2c8   : > { %v2061_v56 = vrot.slane %v2060_v62, 4  ;;  %v2055_v38 = vmax.f32 %v2053_v63, %v2054_v41  ;;  %v2049_v53 = vrot.slane %v2048_v11, 2  ;;  %v4043_v31 = vmax.f32 %v3615_v23, %v1666_v48  ;;  %2985 = vmatprep.subr.msk.bf16.mxu0 %vm3775_vm10, %v2983_v16  ;;  %v4595_v41 = vld [vmem:[#allocation25_spill] sm:$0xff] }
 0x2c9   : > { %v2043_v30 = vmax.f32 %v2041_v3, %v2042_v4  ;;  %v1051_v34 = vcombine.high %v1049_v42, %v1049_v42  ;;  %v1984_v43 = vrot.slane %v1983_v21, 4  ;;  %v1990_v63 = vsel %vm1282_vm1, %v1050_v18, -inf }
 0x2ca   : > { %v4038_v12 = vmax.f32 %v2060_v62, %v2061_v56  ;;  %v2056_v57 = vrot.slane %v2055_v38, 2  ;;  %v4047_v28 = vmax.f32 %v2048_v11, %v2049_v53  ;;  %v4596_v62 = vpack.c.bf16 %v4594_v13, %v4595_v41 }
 0x2cb   : > { %v2044_v3 = vrot.slane %v2043_v30, 1  ;;  %v1991_v23 = vrot.slane %v1990_v63, 4  ;;  %v1997_v59 = vsel %vm1282_vm1, %v1049_v42, -inf  ;;  %v1985_v1 = vmax.f32 %v1983_v21, %v1984_v43 }
 0x2cc   : > { %2988 = vmatpush3.bf16.xpose.msk.msra.mxu0 %vm3775_vm10, %v4596_v62  ;;  %v4055_v56 = vmax.f32 %v2055_v38, %v2056_v57  ;;  %v1998_v4 = vrot.slane %v1997_v59, 4  ;;  %v2004_v16 = vsel %vm1282_vm1, %v1051_v34, -inf  ;;  %v1671_v13 = vrot.slane %v3607_v32, 2 }
 0x2cd   : > { %2991 = vmatprep.subr.msk.bf16.mxu0 %vm3775_vm10, %v2989_v44  ;;  %v4062_v48 = vmax.f32 %v2043_v30, %v2044_v3  ;;  %v1992_v53 = vmax.f32 %v1990_v63, %v1991_v23  ;;  %v2005_v18 = vrot.slane %v2004_v16, 4  ;;  %v1986_v38 = vrot.slane %v1985_v1, 2  ;;  %v4598_v3 = vld [vmem:[#allocation50_spill] sm:$0xff] }
 0x2ce   : > { %v1999_v57 = vmax.f32 %v1997_v59, %v1998_v4  ;;  %v4597_v41 = vrot.slane %v3551_v45, 1  ;;  %v1722_v44 = vrot.slane %v3557_v15, 1  ;;  %v1672_v21 = vmax.f32 %v3607_v32, %v1671_v13  ;;  %v4599_v13 = vld [vmem:[#allocation26_spill] sm:$0xff] }
 0x2cf   : > { %v1993_v62 = vrot.slane %v1992_v53, 2  ;;  %v4069_v36 = vmax.f32 %v2004_v16, %v2005_v18  ;;  %v1727_v30 = vrot.slane %v3553_v26, 2  ;;  %v1987_v34 = vmax.f32 %v1985_v1, %v1986_v38 }
 0x2d0   : > { %v1716_v42 = vmax.f32 %v3551_v45, %v4597_v41  ;;  %v2000_v43 = vrot.slane %v1999_v57, 2  ;;  %v1723_v63 = vmax.f32 %v3557_v15, %v1722_v44  ;;  %v2206_v23 = vmax.f32 %v3549_v46, %v4598_v3  ;;  %v4600_v15 = vld [vmem:[#allocation24_spill] sm:$0xff] }
 0x2d1   : > { %v4076_v59 = vmax.f32 %v1992_v53, %v1993_v62  ;;  %v1673_v4 = vrot.slane %v1672_v21, 1  ;;  %v1728_v45 = vmax.f32 %v3553_v26, %v1727_v30  ;;  %v2207_v16 = vmax.f32 %v3632_v39, %v3574_v55 }
 0x2d2   : > { %v1988_v18 = vrot.slane %v1987_v34, 1  ;;  %v4081_v41 = vmax.f32 %v1999_v57, %v2000_v43  ;;  %v2208_v32 = vmax.f32 %v3968_v8, %v1716_v42  ;;  %v2209_v1 = vmax.f32 %v4043_v31, %v1723_v63 }
 0x2d3   : > { %v4601_v38 = vpack.c.bf16 %v4599_v13, %v4600_v15  ;;  %v1674_v53 = vmax.f32 %v1672_v21, %v1673_v4  ;;  %v1729_v26 = vrot.slane %v1728_v45, 1  ;;  %v4602_v55 = vmax.f32 %v3536_v14, %v3523_v17  ;;  %v4605_v17 = vld [vmem:[#allocation52_spill] sm:$0xff]  ;;  %v4606_v21 = vld [vmem:[#allocation54_spill] sm:$0xff] }
 0x2d4   : > { %v4603_v39 = vmax.f32 %v3539_v2, %v3528_v54  ;;  %v4098_v57 = vmax.f32 %v1987_v34, %v1988_v18  ;;  %v4604_v31 = vmax.f32 %v3541_v51, %v3526_v52  ;;  %v4106_v44 = vadd.f32 %v3624_v24, %v3596_v47 }
 0x2d5   : > { %2994 = vmatpush3.bf16.xpose.msk.msra.mxu0 %vm3775_vm10, %v4601_v38  ;;  %v4110_v62 = vadd.f32 %v3624_v24, %v3618_v61  ;;  %v1730_v14 = vmax.f32 %v1728_v45, %v1729_v26  ;;  %v4115_v2 = vadd.f32 %v3624_v24, %v4605_v17  ;;  %v4119_v52 = vadd.f32 %v3624_v24, %v4606_v21 }
 0x2d6   : > { %v2335_v8 = vsel %vm2307_vm2, %v4603_v39, %v4602_v55  ;;  %v1120_v47 = vcombine.high %v4106_v44, %v4106_v44  ;;  %v1127_v61 = vrot.slane %v4106_v44, %v3153_v10 }
 0x2d7   : > { %v2336_v42 = vsel %vm2309_vm3, %v4604_v31, %v2335_v8  ;;  %v1086_v30 = vcombine.high %v4110_v62, %v4110_v62  ;;  %v2210_v34 = vmax.f32 %v1674_v53, %v1730_v14  ;;  %v1093_v63 = vrot.slane %v4110_v62, %v3153_v10 }
 0x2d8   : > { %v2337_v54 = vsel %vm2311_vm4, %v2206_v23, %v2336_v42  ;;  %v1134_v23 = vrot.slane %v1120_v47, %v3153_v10  ;;  %v1135_v4 = vcombine.high %v1127_v61, %v1127_v61  ;;  %v2123_v45 = vsel %vm1282_vm1, %v1127_v61, -inf }
 0x2d9   : > { %v2338_v51 = vsel %vm2313_vm5, %v2207_v16, %v2337_v54  ;;  %v2124_v18 = vrot.slane %v2123_v45, 4  ;;  %v1100_v13 = vrot.slane %v1086_v30, %v3153_v10  ;;  %v2067_v42 = vsel %vm1282_vm1, %v1093_v63, -inf }
 0x2da   : > { %v2339_v43 = vsel %vm2315_vm6, %v2208_v32, %v2338_v51  ;;  %v1101_v32 = vcombine.high %v1093_v63, %v1093_v63  ;;  %v1136_v38 = vcombine.high %v1134_v23, %v1134_v23  ;;  %v2137_v53 = vsel %vm1282_vm1, %v1134_v23, -inf }
 0x2db   : > { %v2340_v3 = vsel %vm2317_vm7, %v2209_v1, %v2339_v43  ;;  %v2130_v1 = vsel %vm1282_vm1, %v1135_v4, -inf  ;;  %v2125_v26 = vmax.f32 %v2123_v45, %v2124_v18  ;;  %v2138_v39 = vrot.slane %v2137_v53, 4 }
 0x2dc   : > { %v4137_v16 = vsel %vm2319_vm8, %v2210_v34, %v2340_v3  ;;  %v2131_v55 = vrot.slane %v2130_v1, 4  ;;  %v1102_v8 = vcombine.high %v1100_v13, %v1100_v13  ;;  %v2144_v31 = vsel %vm1282_vm1, %v1136_v38, -inf }
 0x2dd   : > { %2376 = vrot.lane.b32.xlu0 %v4137_v16, %s3061_s15  ;;  %v2074_v14 = vsel %vm1282_vm1, %v1101_v32, -inf  ;;  %v2081_v54 = vsel %vm1282_vm1, %v1100_v13, -inf  ;;  %v2126_v17 = vrot.slane %v2125_v26, 2  ;;  %v2139_v51 = vmax.f32 %v2137_v53, %v2138_v39 }
 0x2de   : > { %v2132_v21 = vmax.f32 %v2130_v1, %v2131_v55  ;;  %v2145_v47 = vrot.slane %v2144_v31, 4  ;;  %v2068_v61 = vrot.slane %v2067_v42, 4  ;;  %v2075_v30 = vrot.slane %v2074_v14, 4 }
 0x2df   : > { %v2082_v34 = vrot.slane %v2081_v54, 4  ;;  %v2088_v43 = vsel %vm1282_vm1, %v1102_v8, -inf  ;;  %v2127_v3 = vmax.f32 %v2125_v26, %v2126_v17  ;;  %v2140_v4 = vrot.slane %v2139_v51, 2 }
 0x2e0   : > { %v2133_v23 = vrot.slane %v2132_v21, 2  ;;  %v2146_v45 = vmax.f32 %v2144_v31, %v2145_v47  ;;  %v2069_v18 = vmax.f32 %v2067_v42, %v2068_v61  ;;  %v2076_v38 = vmax.f32 %v2074_v14, %v2075_v30 }
 0x2e1   : > { %v2083_v63 = vmax.f32 %v2081_v54, %v2082_v34  ;;  %v2089_v15 = vrot.slane %v2088_v43, 4  ;;  %v2128_v32 = vrot.slane %v2127_v3, 1  ;;  %v2141_v13 = vmax.f32 %v2139_v51, %v2140_v4 }
 0x2e2   : > { %v2134_v22 = vmax.f32 %v2132_v21, %v2133_v23  ;;  %v2147_v49 = vrot.slane %v2146_v45, 2  ;;  %v2070_v1 = vrot.slane %v2069_v18, 2  ;;  %v2077_v53 = vrot.slane %v2076_v38, 2 }
 0x2e3   : > { %v2084_v55 = vrot.slane %v2083_v63, 2  ;;  %v2090_v39 = vmax.f32 %v2088_v43, %v2089_v15  ;;  %v4151_v11 = vmax.f32 %v2127_v3, %v2128_v32  ;;  %v2142_v8 = vrot.slane %v2141_v13, 1 }
 0x2e4   : > { %v2135_v46 = vrot.slane %v2134_v22, 1  ;;  %v2148_v26 = vmax.f32 %v2146_v45, %v2147_v49  ;;  %v2071_v17 = vmax.f32 %v2069_v18, %v2070_v1  ;;  %v2078_v24 = vmax.f32 %v2076_v38, %v2077_v53  ;;  %v4618_v53 = vld [vmem:[#allocation45_spill] sm:$0xff]  ;;  %v4622_v1 = vld [vmem:[#allocation55_spill] sm:$0xff] }
 0x2e5   : > { %v2085_v31 = vmax.f32 %v2083_v63, %v2084_v55  ;;  %v2091_v42 = vrot.slane %v2090_v39, 2  ;;  %v4155_v54 = vmax.f32 %v2141_v13, %v2142_v8  ;;  %v1144_v51 = vrot.slane %v4115_v2, %v3153_v10 }
 0x2e6   : > { %v4153_v14 = vmax.f32 %v2134_v22, %v2135_v46  ;;  %v2149_v21 = vrot.slane %v2148_v26, 1  ;;  %v2072_v47 = vrot.slane %v2071_v17, 1  ;;  %v2079_v61 = vrot.slane %v2078_v24, 1 }
 0x2e7   : > { %v2086_v15 = vrot.slane %v2085_v31, 1  ;;  %v2092_v30 = vmax.f32 %v2090_v39, %v2091_v42  ;;  %v4607_v49 = vcombine.high %v4115_v2, %v4115_v2  ;;  %v1152_v3 = vcombine.high %v1144_v51, %v1144_v51 }
 0x2e8   : > { %v4159_v34 = vmax.f32 %v2148_v26, %v2149_v21  ;;  %v2151_v22 = vsel %vm1282_vm1, %v1144_v51, -inf  ;;  %v4166_v46 = vmax.f32 %v2071_v17, %v2072_v47  ;;  %v4168_v23 = vmax.f32 %v2078_v24, %v2079_v61 }
 0x2e9   : > { %v1151_v43 = vrot.slane %v4607_v49, %v3153_v10  ;;  %v4170_v4 = vmax.f32 %v2085_v31, %v2086_v15  ;;  %v2093_v45 = vrot.slane %v2092_v30, 1  ;;  %v2152_v38 = vrot.slane %v2151_v22, 4 }
 0x2ea   : > { %v2158_v63 = vsel %vm1282_vm1, %v1152_v3, -inf  ;;  %v3001_v31 = vpack.c.bf16 %v4115_v2, %v4106_v44  ;;  %v1103_v42 = vcombine.high %v4119_v52, %v4119_v52  ;;  %v1110_v21 = vrot.slane %v4119_v52, %v3153_v10 }
 0x2eb   : > { %v1153_v18 = vcombine.high %v1151_v43, %v1151_v43  ;;  %v2165_v32 = vsel %vm1282_vm1, %v1151_v43, -inf  ;;  %v4174_v13 = vmax.f32 %v2092_v30, %v2093_v45  ;;  %v2153_v55 = vmax.f32 %v2151_v22, %v2152_v38 }
 0x2ec   : > { %v2159_v39 = vrot.slane %v2158_v63, 4  ;;  %v2166_v8 = vrot.slane %v2165_v32, 4  ;;  %v2995_v15 = vpack.c.bf16 %v4119_v52, %v4110_v62  ;;  %v1117_v49 = vrot.slane %v1103_v42, %v3153_v10  ;;  %v4609_v10 = vld [vmem:[#allocation51_spill] sm:$0xff] }
 0x2ed   : > { %v2172_v26 = vsel %vm1282_vm1, %v1153_v18, -inf  ;;  %v2154_v51 = vrot.slane %v2153_v55, 2  ;;  %v1118_v43 = vcombine.high %v1110_v21, %v1110_v21  ;;  %v2095_v3 = vsel %vm1282_vm1, %v1110_v21, -inf }
 0x2ee   : > { %v2173_v17 = vrot.slane %v2172_v26, 4  ;;  %v2160_v47 = vmax.f32 %v2158_v63, %v2159_v39  ;;  %v2167_v61 = vmax.f32 %v2165_v32, %v2166_v8  ;;  %v2096_v45 = vrot.slane %v2095_v3, 4  ;;  %2997 = vmatprep.subr.msk.bf16.mxu0 %vm3775_vm10, %v2995_v15  ;;  %v4610_v32 = vld [vmem:[#allocation44_spill] sm:$0xff] }
 0x2ef   : > { %v2155_v44 = vmax.f32 %v2153_v55, %v2154_v51  ;;  %v1119_v18 = vcombine.high %v1117_v49, %v1117_v49  ;;  %v2102_v38 = vsel %vm1282_vm1, %v1118_v43, -inf  ;;  %v2109_v63 = vsel %vm1282_vm1, %v1117_v49, -inf }
 0x2f0   : > { %v4191_v30 = vmax.f32 %v2172_v26, %v2173_v17  ;;  %v2161_v2 = vrot.slane %v2160_v47, 2  ;;  %v2168_v22 = vrot.slane %v2167_v61, 2  ;;  %v4608_v62 = vrot.slane %v3746_v19, 1 }
 0x2f1   : > { %v4611_v39 = vpack.c.bf16 %v4609_v10, %v4610_v32  ;;  %v2156_v55 = vrot.slane %v2155_v44, 1  ;;  %v2097_v17 = vmax.f32 %v2095_v3, %v2096_v45  ;;  %v2103_v42 = vrot.slane %v2102_v38, 4 }
 0x2f2   : > { %v1772_v52 = vmax.f32 %v3746_v19, %v4608_v62  ;;  %v4207_v8 = vmax.f32 %v2160_v47, %v2161_v2  ;;  %v4209_v26 = vmax.f32 %v2167_v61, %v2168_v22  ;;  %v2110_v21 = vrot.slane %v2109_v63, 4 }
 0x2f3   : > { %3000 = vmatpush3.bf16.xpose.msk.msra.mxu0 %vm3775_vm10, %v4611_v39  ;;  %v2116_v51 = vsel %vm1282_vm1, %v1119_v18, -inf  ;;  %v1778_v19 = vrot.slane %v3751_v7, 1  ;;  %v4215_v15 = vmax.f32 %v2155_v44, %v2156_v55  ;;  %v2098_v43 = vrot.slane %v2097_v17, 2  ;;  %v4613_v55 = vld [vmem:[#allocation63_spill] sm:$0xff] }
 0x2f4   : > { %3003 = vmatprep.subr.msk.bf16.mxu0 %vm3775_vm10, %v3001_v31  ;;  %v2163_v49 = vrot.slane %v4207_v8, 1  ;;  %v2117_v62 = vrot.slane %v2116_v51, 4  ;;  %v2104_v47 = vmax.f32 %v2102_v38, %v2103_v42  ;;  %v2111_v2 = vmax.f32 %v2109_v63, %v2110_v21  ;;  %v4614_v42 = vld [vmem:[#allocation59_spill] sm:$0xff]  ;;  %v4615_v21 = vld [vmem:[#allocation62_spill] sm:$0xff] }
 0x2f5   : > { %v1779_v61 = vmax.f32 %v3751_v7, %v1778_v19  ;;  %v1783_v3 = vrot.slane %v3739_v37, 2  ;;  %v2099_v22 = vmax.f32 %v2097_v17, %v2098_v43  ;;  %v4612_v45 = vrot.slane %v3725_v25, 1  ;;  %v4617_v19 = vld [vmem:[#allocation21_spill] sm:$0xff] }
 0x2f6   : > { %v4220_v31 = vmax.f32 %v2116_v51, %v2117_v62  ;;  %v1834_v44 = vrot.slane %v3727_v0, 1  ;;  %v2105_v10 = vrot.slane %v2104_v47, 2  ;;  %v2112_v32 = vrot.slane %v2111_v2, 2  ;;  %v4616_v51 = vld [vmem:[#allocation64_spill] sm:$0xff] }
 0x2f7   : > { %v1828_v18 = vmax.f32 %v3725_v25, %v4612_v45  ;;  %v1784_v39 = vmax.f32 %v3739_v37, %v1783_v3  ;;  %v1839_v38 = vrot.slane %v4613_v55, 2  ;;  %v2100_v63 = vrot.slane %v2099_v22, 1  ;;  %v4619_v37 = vld [vmem:[#allocation39_spill] sm:$0xff] }
 0x2f8   : > { %v1835_v7 = vmax.f32 %v3727_v0, %v1834_v44  ;;  %v2214_v17 = vmax.f32 %v4615_v21, %v4614_v42  ;;  %v2215_v43 = vmax.f32 %v4617_v19, %v4616_v51  ;;  %v4233_v62 = vmax.f32 %v2104_v47, %v2105_v10  ;;  %v4621_v21 = vld [vmem:[#allocation56_spill] sm:$0xff]  ;;  %v4625_v10 = vld [vmem:[#allocation57_spill] sm:$0xff] }
 0x2f9   : > { %v4235_v25 = vmax.f32 %v2111_v2, %v2112_v32  ;;  %v1785_v45 = vrot.slane %v1784_v39, 1  ;;  %v1840_v24 = vmax.f32 %v4613_v55, %v1839_v38  ;;  %v4620_v3 = vpack.c.bf16 %v4618_v53, %v4619_v37  ;;  %v4624_v47 = vld [vmem:[#allocation60_spill] sm:$0xff]  ;;  %v4627_v53 = vld [vmem:[#allocation61_spill] sm:$0xff]  ;;  %v4628_v37 = vld [vmem:[#allocation58_spill] sm:$0xff] }
 0x2fa   : > { %v4243_v0 = vmax.f32 %v2099_v22, %v2100_v63  ;;  %v2216_v44 = vmax.f32 %v1772_v52, %v1828_v18  ;;  %v2217_v42 = vmax.f32 %v1779_v61, %v1835_v7  ;;  %v4623_v51 = vmax.f32 %v4621_v21, %v4622_v1  ;;  %v4631_v63 = vld [vmem:[#allocation22_spill] sm:$0xff] }
 0x2fb   : > { %3006 = vmatpush3.bf16.xpose.msk.msra.mxu0 %vm3775_vm10, %v4620_v3  ;;  %v4626_v2 = vmax.f32 %v4624_v47, %v4625_v10  ;;  %v2107_v55 = vrot.slane %v4233_v62, 1  ;;  %v1786_v38 = vmax.f32 %v1784_v39, %v1785_v45  ;;  %v1841_v19 = vrot.slane %v1840_v24, 1  ;;  %v4632_v39 = vld [vmem:[#allocation14_spill] sm:$0xff]  ;;  %v4634_v47 = vld [vmem:[#allocation12_spill] sm:$0xff] }
 0x2fc   : > { %v4629_v50 = vmax.f32 %v4627_v53, %v4628_v37  ;;  %v4630_v61 = vrot.slane %v3916_v5, 1  ;;  %v1890_v18 = vrot.slane %v3923_v58, 1  ;;  %v1895_v7 = vrot.slane %v4631_v63, 2 }
 0x2fd   : > { %v2342_v32 = vsel %vm2307_vm2, %v4626_v2, %v4623_v51  ;;  %v1842_v3 = vmax.f32 %v1840_v24, %v1841_v19  ;;  %v4633_v45 = vrot.slane %v4632_v39, 1  ;;  %v1946_v10 = vrot.slane %v4634_v47, 1  ;;  %v4637_v19 = vld [vmem:[#allocation11_spill] sm:$0xff] }
 0x2fe   : > { %v2343_v22 = vsel %vm2309_vm3, %v4629_v50, %v2342_v32  ;;  %v1884_v1 = vmax.f32 %v3916_v5, %v4630_v61  ;;  %v1896_v32 = vmax.f32 %v4631_v63, %v1895_v7  ;;  %v4635_v5 = vld [vmem:[#allocation17_spill] sm:$0xff]  ;;  %v4640_v63 = vld [vmem:[#allocation15_spill] sm:$0xff] }
 0x2ff   : > { %v2344_v52 = vsel %vm2311_vm4, %v2214_v17, %v2343_v22  ;;  %v1940_v51 = vmax.f32 %v4632_v39, %v4633_v45  ;;  %v1891_v17 = vmax.f32 %v3923_v58, %v1890_v18  ;;  %v1951_v53 = vrot.slane %v4635_v5, 2  ;;  %v4638_v39 = vld [vmem:[#allocation20_spill] sm:$0xff]  ;;  %v4639_v45 = vld [vmem:[#allocation27_spill] sm:$0xff] }
 0x300   : > { %v2345_v21 = vsel %vm2313_vm5, %v2215_v43, %v2344_v52  ;;  %v2218_v37 = vmax.f32 %v1786_v38, %v1842_v3  ;;  %v1947_v24 = vmax.f32 %v4634_v47, %v1946_v10  ;;  %v4636_v43 = vld [vmem:[#allocation28_spill] sm:$0xff]  ;;  %v1897_v52 = vrot.slane %v1896_v32, 1  ;;  %v4641_v38 = vld [vmem:[#allocation13_spill] sm:$0xff]  ;;  %v4644_v3 = vld [vmem:[#allocation19_spill] sm:$0xff] }
 0x301   : > { %v2346_v2 = vsel %vm2315_vm6, %v2216_v44, %v2345_v21  ;;  %v2222_v22 = vmax.f32 %v4637_v19, %v4636_v43  ;;  %v1952_v61 = vmax.f32 %v4635_v5, %v1951_v53  ;;  %v2223_v44 = vmax.f32 %v4639_v45, %v4638_v39  ;;  %v4647_v53 = vld [vmem:[#allocation16_spill] sm:$0xff] }
 0x302   : > { %v2347_v50 = vsel %vm2317_vm7, %v2217_v42, %v2346_v2  ;;  %v2224_v21 = vmax.f32 %v1884_v1, %v1940_v51  ;;  %v2225_v18 = vmax.f32 %v1891_v17, %v1947_v24  ;;  %v4642_v7 = vmax.f32 %v4640_v63, %v4641_v38  ;;  %v4643_v42 = vld [vmem:[#allocation10_spill] sm:$0xff] }
 0x303   : > { %v4280_v58 = vsel %vm2319_vm8, %v2218_v37, %v2347_v50  ;;  %v4645_v47 = vmax.f32 %v4643_v42, %v4644_v3  ;;  %v4646_v2 = vrot.slane %v4076_v59, 1  ;;  %v1898_v1 = vmax.f32 %v1896_v32, %v1897_v52  ;;  %v4648_v37 = vld [vmem:[#allocation23_spill] sm:$0xff] }
 0x304   : > { %2378 = vrot.lane.b32.xlu1 %v4280_v58, %s3061_s15  ;;  %v1953_v51 = vrot.slane %v1952_v61, 1  ;;  %v4649_v17 = vmax.f32 %v4647_v53, %v4648_v37  ;;  %v2002_v24 = vrot.slane %v4081_v41, 1  ;;  %v2007_v19 = vrot.slane %v4069_v36, 2 }
 0x305   : > { %v2349_v10 = vsel %vm2307_vm2, %v4645_v47, %v4642_v7  ;;  %v1996_v5 = vmax.f32 %v4076_v59, %v4646_v2  ;;  %v4650_v39 = vrot.slane %v4047_v28, 1  ;;  %v2058_v45 = vrot.slane %v4055_v56, 1 }
 0x306   : > { %v2350_v50 = vsel %vm2309_vm3, %v4649_v17, %v2349_v10  ;;  %v1954_v63 = vmax.f32 %v1952_v61, %v1953_v51  ;;  %v2003_v52 = vmax.f32 %v4081_v41, %v2002_v24  ;;  %v2063_v38 = vrot.slane %v4038_v12, 2 }
 0x307   : > { %v2351_v43 = vsel %vm2311_vm4, %v2222_v22, %v2350_v50  ;;  %v2052_v59 = vmax.f32 %v4047_v28, %v4650_v39  ;;  %v2008_v42 = vmax.f32 %v4069_v36, %v2007_v19  ;;  %v2059_v22 = vmax.f32 %v4055_v56, %v2058_v45  ;;  %v4658_v45 = vld [vmem:[#allocation53_spill] sm:$0xff] }
 0x308   : > { %v2352_v32 = vsel %vm2313_vm5, %v2223_v44, %v2351_v43  ;;  %v2230_v3 = vmax.f32 %v4022_v33, %v4007_v29  ;;  %v2226_v47 = vmax.f32 %v1898_v1, %v1954_v63  ;;  %v2064_v61 = vmax.f32 %v4038_v12, %v2063_v38 }
 0x309   : > { %v2353_v7 = vsel %vm2315_vm6, %v2224_v21, %v2352_v32  ;;  %v2231_v44 = vmax.f32 %v4098_v57, %v4062_v48  ;;  %v2009_v41 = vrot.slane %v2008_v42, 1  ;;  %v2232_v10 = vmax.f32 %v1996_v5, %v2052_v59 }
 0x30a   : > { %v2354_v28 = vsel %vm2317_vm7, %v2225_v18, %v2353_v7  ;;  %v2233_v2 = vmax.f32 %v2003_v52, %v2059_v22  ;;  %v4651_v21 = vmax.f32 %v4005_v40, %v3997_v35  ;;  %v4652_v36 = vmax.f32 %v4014_v60, %v3999_v9  ;;  %v2373_v22 = vpop.permute.xlu1 %2372 }
 0x30b   : > { %v2355_v29 = vsel %vm2319_vm8, %v2226_v47, %v2354_v28  ;;  %v2065_v33 = vrot.slane %v2064_v61, 1  ;;  %v4653_v12 = vmax.f32 %v4016_v20, %v4001_v6  ;;  %v2108_v48 = vmax.f32 %v4233_v62, %v2107_v55 }
 0x30c   : > { %v2356_v56 = vsel %vm2307_vm2, %v4652_v36, %v4651_v21  ;;  %v3037_v57 = vpack.i.bf16 %v2355_v29, %v4280_v58  ;;  %2380 = vrot.lane.b32.xlu0 %v2355_v29, %s3061_s15  ;;  %v2010_v35 = vmax.f32 %v2008_v42, %v2009_v41  ;;  %v2114_v9 = vrot.slane %v4235_v25, 1  ;;  %v2371_v42 = vpop.permute.xlu0 %2370 }
 0x30d   : > { %v2357_v18 = vsel %vm2309_vm3, %v4653_v12, %v2356_v56  ;;  %v2066_v60 = vmax.f32 %v2064_v61, %v2065_v33  ;;  %v2119_v1 = vrot.slane %v4220_v31, 2  ;;  %v2164_v6 = vmax.f32 %v4207_v8, %v2163_v49 }
 0x30e   : > { %v2358_v40 = vsel %vm2311_vm4, %v2230_v3, %v2357_v18  ;;  %v2115_v62 = vmax.f32 %v4235_v25, %v2114_v9  ;;  %v2170_v55 = vrot.slane %v4209_v26, 1  ;;  %v2175_v58 = vrot.slane %v4191_v30, 2 }
 0x30f   : > { %v2359_v5 = vsel %vm2313_vm5, %v2231_v44, %v2358_v40  ;;  %v2234_v51 = vmax.f32 %v2010_v35, %v2066_v60  ;;  %v2120_v37 = vmax.f32 %v4220_v31, %v2119_v1  ;;  %v2238_v17 = vmax.f32 %v4174_v13, %v4159_v34 }
 0x310   : > { %v2360_v20 = vsel %vm2315_vm6, %v2232_v10, %v2359_v5  ;;  %v2171_v50 = vmax.f32 %v4209_v26, %v2170_v55  ;;  %v2176_v8 = vmax.f32 %v4191_v30, %v2175_v58  ;;  %v2239_v49 = vmax.f32 %v4243_v0, %v4215_v15 }
 0x311   : > { %v2361_v53 = vsel %vm2317_vm7, %v2233_v2, %v2360_v20  ;;  %v2240_v25 = vmax.f32 %v2108_v48, %v2164_v6  ;;  %v2121_v43 = vrot.slane %v2120_v37, 1  ;;  %v4654_v19 = vmax.f32 %v4166_v46, %v4151_v11 }
 0x312   : > { %v2362_v24 = vsel %vm2319_vm8, %v2234_v51, %v2361_v53  ;;  %v4655_v31 = vmax.f32 %v4168_v23, %v4153_v14  ;;  %v2177_v34 = vrot.slane %v2176_v8, 1  ;;  %v2241_v13 = vmax.f32 %v2115_v62, %v2171_v50  ;;  %v4657_v23 = vld [vmem:[#allocation18_spill] sm:$0xff] }
 0x313   : > { %2382 = vrot.lane.b32.xlu1 %v2362_v24, %s3061_s15  ;;  %v4656_v30 = vmax.f32 %v4170_v4, %v4155_v54  ;;  %v3062_v15 = vmov 0.0|0.0   ;;  %v2122_v0 = vmax.f32 %v2120_v37, %v2121_v43  ;;  %v4659_v63 = vpack.i.bf16 %v4657_v23, %v4658_v45 }
 0x314   : > { %v2363_v39 = vsel %vm2307_vm2, %v4655_v31, %v4654_v19  ;;  %2947 = vmatprep.subr.bf16.mxu1 %v3062_v15  ;;  %v2178_v11 = vmax.f32 %v2176_v8, %v2177_v34  ;;  %v4660_v38 = vpack.i.bf16 %v4137_v16, %v3987_v27  ;;  %v3065_v7 = vmov 0.0  }
 0x315   : > { %v2364_v26 = vsel %vm2309_vm3, %v4656_v30, %v2363_v39  ;;  %2944 = vmatprep.mubr.msk.f32.mxu1 %vm3064_vm11, %v3065_v7 }
 0x316   : > { %v2365_v59 = vsel %vm2311_vm4, %v2238_v17, %v2364_v26  ;;  %v2242_v32 = vmax.f32 %v2122_v0, %v2178_v11 }
 0x317   : > { %v2366_v46 = vsel %vm2313_vm5, %v2239_v49, %v2365_v59  ;;  %3028 = vrot.lane.b32.xlu1 %v4659_v63, %s3063_s16 }
 0x318   : > { %v2367_v14 = vsel %vm2315_vm6, %v2240_v25, %v2366_v46 }
 0x319   : > { %v2368_v54 = vsel %vm2317_vm7, %v2241_v13, %v2367_v14 }
 0x31a   : > { %v2369_v4 = vsel %vm2319_vm8, %v2242_v32, %v2368_v54 }
 0x31b   : > { %v3042_v52 = vpack.i.bf16 %v2369_v4, %v2362_v24  ;;  %2384 = vrot.lane.b32.xlu0 %v2369_v4, %s3061_s15  ;;  %3038 = vrot.lane.b32.xlu1 %v3037_v57, %s3063_s16 }
 0x31f   : > { %3033 = vrot.lane.b32.xlu0 %v4660_v38, %s3063_s16 }
 0x323   : > { %3043 = vrot.lane.b32.xlu0 %v3042_v52, %s3063_s16 }
 0x327   : > { %v2375_v3 = vpop.permute.xlu1 %2374 }
 0x344   : > { %2394 = vxpose.xlu1.b32.start [1/8] (short) (narrow) %v2371_v42, 8 }
 0x348   : > { %2395 = vxpose.xlu1.b32.cont [2/8] (short) (narrow) %v2373_v22, 8 }
 0x34c   : > { %2396 = vxpose.xlu1.b32.cont [3/8] (short) (narrow) %v2375_v3, 8 }
 0x34f   : > { %v2377_v47 = vpop.permute.xlu0 %2376 }
 0x350   : > { %2397 = vxpose.xlu1.b32.cont [4/8] (short) (narrow) %v2377_v47, 8 }
 0x376   : > { %v2379_v28 = vpop.permute.xlu1 %2378 }
 0x377   : > { %2398 = vxpose.xlu1.b32.cont [5/8] (short) (narrow) %v2379_v28, 8 }
 0x37e   : > { %v2381_v61 = vpop.permute.xlu0 %2380 }
 0x37f   : > { %2399 = vxpose.xlu1.b32.cont [6/8] (short) (narrow) %v2381_v61, 8 }
 0x385   : > { %v2383_v44 = vpop.permute.xlu1 %2382 }
 0x386   : > { %2400 = vxpose.xlu1.b32.cont [7/8] (short) (narrow) %v2383_v44, 8 }
 0x389   : > { %v3029_v27 = vpop.permute.xlu1 %3028 }
 0x38a   : > { %v3031_v16 = vunpack.i.h.bf16 %v3029_v27  ;;  %v3030_v41 = vunpack.i.l.bf16 %v3029_v27 }
 0x38c   : > { %v2948_v2 = vpack.c.bf16 %v3031_v16, %v3030_v41 }
 0x38d   : > { %v2385_v10 = vpop.permute.xlu0 %2384  ;;  %v3039_v21 = vpop.permute.xlu1 %3038 }
 0x38e   : > { %2401 = vxpose.xlu1.b32.end [8/8] (short) (narrow) %v2385_v10, 8  ;;  %2949 = vmatpush3.bf16.msra.mxu1 %v2948_v2  ;;  %v3041_v33 = vunpack.i.h.bf16 %v3039_v21  ;;  %v3040_v12 = vunpack.i.l.bf16 %v3039_v21 }
 0x38f   : > { %2950 = vmatprep.subr.bf16.mxu1 %v3062_v15 }
 0x390   : > { %v2954_v57 = vpack.c.bf16 %v3041_v33, %v3040_v12 }
 0x391   : > { %v3034_v36 = vpop.permute.xlu0 %3033 }
 0x392   : > { %v3036_v56 = vunpack.i.h.bf16 %v3034_v36  ;;  %v3035_v29 = vunpack.i.l.bf16 %v3034_v36 }
 0x394   : > { %v2951_v18 = vpack.c.bf16 %v3036_v56, %v3035_v29 }
 0x395   : > { %v3044_v48 = vpop.permute.xlu0 %3043 }
 0x396   : > { %2952 = vmatpush3.bf16.msra.mxu1 %v2951_v18  ;;  %v3046_v35 = vunpack.i.h.bf16 %v3044_v48  ;;  %v3045_v40 = vunpack.i.l.bf16 %v3044_v48 }
 0x397   : > { %2953 = vmatprep.subr.bf16.mxu1 %v3062_v15 }
 0x398   : > { %v2957_v9 = vpack.c.bf16 %v3046_v35, %v3045_v40 }
 0x39a   : > { %2955 = vmatpush3.bf16.msra.mxu1 %v2954_v57 }
 0x39b   : > { %2956 = vmatprep.subr.bf16.mxu1 %v3062_v15 }
 0x39e   : > { %2958 = vmatpush3.bf16.msra.mxu1 %v2957_v9 }
 0x3f2   : > { %v2410_v60 = vpop.trf.xlu1 }
 0x3f3   : > { %2945 = vmatmul.mubr.msk.f32.vlgmr.msra.gmra.mrb[0].mxu1 %vm2450_vm12, %v2410_v60 }
 0x4c6   : > { %v2520_v5 = vpop.f32.mrb[0].mxu1 }
 0x4c7   : > { %v2524_v1 = vmul.f32 0.015625, %v2520_v5  ;;  %v2946_v6 = vpop.f32.mrb[1].mxu1 }
 0x4c9   : > { %2890 = vmatprep.mubr.msk.f32.mxu0 %vm2525_vm9, %v2524_v1 }
 0x4ca   : > { %2891 = vmatmul.mubr.msk.f32.vlgmr.msra.gmra.mrb[32].mxu0 %vm2525_vm9, %v2524_v1 }
 0x59d   : > { %v2659_v20 = vpop.f32.mrb[32].mxu0 }
 0x59e   : > { %v2661_v62 = vpop.f32.mrb[33].mxu0  ;;  %2664 = vst [vmem:[%s231_s22] sm:$0xff] %v2659_v20  ;;  %v2669_v55 = vmul.f32 %v2659_v20, %v2659_v20 }
 0x59f   : > { %2665 = vst [vmem:[%s231_s22 + $0x8] sm:$0xff] %v2661_v62  ;;  %v2670_v58 = vmul.f32 %v2661_v62, %v2661_v62  ;;  %v2666_v51 = vadd.f32 %v2661_v62, %v2659_v20 }
 0x5a1   : > { %2667 = vadd.xlane.f32.xlu0 %v2666_v51  ;;  %v2671_v53 = vadd.f32 %v2670_v58, %v2669_v55 }
 0x5a5   : > { %2672 = vadd.xlane.f32.xlu0 %v2671_v53 }
 0x62e   : > { %v2668_v37 = vpop.xlane.xlu0 %2667 }
 0x632   : > { %v2673_v17 = vpop.xlane.xlu0 %2672 }
 0x633   : > { %v2675_v50 = vsel %vm2674_vm13, %v2668_v37, %v2673_v17 }
 0x634   : > { %2677 = vst.msk [vmem:[%s235_s26] sm:$0xff] %vm2676_vm14, %v2675_v50 }
 0x635 PF: > { %s16_s18 = sadd.s32 1, %s3056_s18  }
 0x636   : > { %p13_p4 = scmp.ge.s32.totalorder %s16_s18, 4  }
 0x638   :  { %15 = sbr.rel (!%p13_p4) target bundleno = 1 (0x1), region = 78 }

</bundles_post_ra>
